<compile_context>
chip_gen: v7x
topology: tpu7x:2x2x1
jax: 0.10.0
libtpu: 0.0.40
codegen_flags: <defaults>
</compile_context>

<pallas_src>
import jax
import jax.numpy as jnp
from jax.experimental import pallas as pl
from jax.experimental.pallas import tpu as pltpu

EPS = 1e-5


def _bn_kernel(x_ref, gamma_ref, beta_ref, o_ref):
    # x_ref: [M, Ct] f32 (rows = N*H*W on sublanes, channels on lanes)
    # gamma_ref / beta_ref: [1, Ct] f32 (broadcast across sublanes for free)
    x = x_ref[...]
    m = x.shape[0]
    inv_m = 1.0 / m
    # Two-pass centered variance (numerically safe; matches jnp.var biased).
    mean = jnp.sum(x, axis=0, keepdims=True) * inv_m          # [1, Ct]
    xc = x - mean
    var = jnp.sum(xc * xc, axis=0, keepdims=True) * inv_m     # [1, Ct]
    inv_std = jax.lax.rsqrt(var + EPS)
    scale = inv_std * gamma_ref[...]                          # [1, Ct]
    o_ref[...] = xc * scale + beta_ref[...]


def _pick_c_tile(c):
    # Small grid (2-4 steps) is enough to overlap DMA with compute at this
    # size; keep tiles lane-dense (multiples of 128) when possible.
    for t in (128, 256):
        if c % t == 0 and c // t in (2, 4):
            return t
    for t in (256, 128):
        if c % t == 0:
            return t
    return c


def batchnorm2d_nhwc(x_nhwc, gamma, beta):
    """BatchNorm2d forward on NHWC input (no wrapper transposes needed).

    x_nhwc: [N, H, W, C] float32
    gamma, beta: [C] float32
    returns: [N, H, W, C] float32
    """
    n, h, w, c = x_nhwc.shape
    m = n * h * w
    x_mc = x_nhwc.reshape(m, c)
    gamma_1c = gamma.reshape(1, c)
    beta_1c = beta.reshape(1, c)

    c_tile = _pick_c_tile(c)
    grid = (c // c_tile,)

    cost = pl.CostEstimate(
        flops=5 * m * c,
        transcendentals=c,
        bytes_accessed=2 * m * c * 4 + 2 * c * 4,
    )

    out_mc = pl.pallas_call(
        _bn_kernel,
        out_shape=jax.ShapeDtypeStruct((m, c), jnp.float32),
        grid_spec=pltpu.PrefetchScalarGridSpec(
            num_scalar_prefetch=0,
            grid=grid,
            in_specs=[
                pl.BlockSpec((m, c_tile), lambda i: (0, i)),
                pl.BlockSpec((1, c_tile), lambda i: (0, i)),
                pl.BlockSpec((1, c_tile), lambda i: (0, i)),
            ],
            out_specs=pl.BlockSpec((m, c_tile), lambda i: (0, i)),
        ),
        compiler_params=pltpu.CompilerParams(
            dimension_semantics=("parallel",),
        ),
        cost_estimate=cost,
    )(x_mc, gamma_1c, beta_1c)

    return out_mc.reshape(n, h, w, c)


def batchnorm2d(x_nchw, gamma, beta):
    """BatchNorm2d forward on NCHW input (PyTorch layout).

    x_nchw: [N, C, H, W] float32
    gamma, beta: [C] float32
    returns: [N, C, H, W] float32
    """
    # TODO(synk): for N>1 pipelines, adopt NHWC end-to-end (batchnorm2d_nhwc)
    # to avoid these two XLA transposes, which cost a full HBM round trip each.
    n, c, h, w = x_nchw.shape
    x_nhwc = jnp.transpose(x_nchw, (0, 2, 3, 1))
    out_nhwc = batchnorm2d_nhwc(x_nhwc, gamma, beta)
    return jnp.transpose(out_nhwc, (0, 3, 1, 2))


def _reference(x_nchw, gamma, beta):
    mean = jnp.mean(x_nchw, axis=(0, 2, 3), keepdims=True)
    var = jnp.var(x_nchw, axis=(0, 2, 3), keepdims=True)  # biased
    xhat = (x_nchw - mean) * jax.lax.rsqrt(var + EPS)
    return xhat * gamma[None, :, None, None] + beta[None, :, None, None]


if __name__ == "__main__":
    key = jax.random.PRNGKey(0)
    k_x, k_g, k_b = jax.random.split(key, 3)

    # Shape matches the module's input: [1, 512, 28, 28] (~1.6 MB, small).
    N, C, H, W = 1, 512, 28, 28
    x = jax.random.normal(k_x, (N, C, H, W), dtype=jnp.float32)

    # Deterministic non-trivial affine params to exercise the affine path.
    gamma = 1.0 + 0.1 * jax.random.normal(k_g, (C,), dtype=jnp.float32)
    beta = 0.1 * jax.random.normal(k_b, (C,), dtype=jnp.float32)

    out = batchnorm2d(x, gamma, beta)
    out = jax.block_until_ready(out)

    ref = _reference(x, gamma, beta)
    assert out.shape == (N, C, H, W)
    assert jnp.max(jnp.abs(out - ref)) < 1e-4

    print("KERNEL_OK")
</pallas_src>

<mosaic_0001>
module attributes {stable_mosaic.version = 11 : i64} {
  func.func @_bn_kernel(%arg0: i32, %arg1: memref<784x128xf32, #tpu.memory_space<vmem>>, %arg2: memref<1x128xf32, #tpu.memory_space<vmem>>, %arg3: memref<1x128xf32, #tpu.memory_space<vmem>>, %arg4: memref<784x128xf32, #tpu.memory_space<vmem>>) attributes {dimension_semantics = [#tpu.dimension_semantics<parallel>], iteration_bounds = array<i64: 4>, scalar_prefetch = 0 : i64, scratch_operands = 0 : i64, tpu.core_type = #tpu.core_type<tc>, window_params = [{transform_indices = @transform_0, window_bounds = array<i64: 784, 128>}, {transform_indices = @transform_1, window_bounds = array<i64: 1, 128>}, {transform_indices = @transform_2, window_bounds = array<i64: 1, 128>}, {transform_indices = @transform_3, window_bounds = array<i64: 784, 128>}]} {
    %c0 = arith.constant 0 : index
    %c0_0 = arith.constant 0 : index
    %0 = vector.load %arg1[%c0, %c0_0] : memref<784x128xf32, #tpu.memory_space<vmem>>, vector<784x128xf32>
    %cst = arith.constant dense<0.000000e+00> : vector<128xf32>
    %1 = vector.multi_reduction <add>, %0, %cst [0] : vector<784x128xf32> to vector<128xf32>
    %2 = vector.shape_cast %1 : vector<128xf32> to vector<1x128xf32>
    %cst_1 = arith.constant 0.00127551018 : f32
    %3 = vector.broadcast %cst_1 : f32 to vector<1x128xf32>
    %4 = arith.mulf %2, %3 : vector<1x128xf32>
    %5 = vector.broadcast %4 : vector<1x128xf32> to vector<784x128xf32>
    %6 = arith.subf %0, %5 : vector<784x128xf32>
    %7 = arith.mulf %6, %6 : vector<784x128xf32>
    %cst_2 = arith.constant dense<0.000000e+00> : vector<128xf32>
    %8 = vector.multi_reduction <add>, %7, %cst_2 [0] : vector<784x128xf32> to vector<128xf32>
    %9 = vector.shape_cast %8 : vector<128xf32> to vector<1x128xf32>
    %cst_3 = arith.constant 0.00127551018 : f32
    %10 = vector.broadcast %cst_3 : f32 to vector<1x128xf32>
    %11 = arith.mulf %9, %10 : vector<1x128xf32>
    %cst_4 = arith.constant 9.99999974E-6 : f32
    %12 = vector.broadcast %cst_4 : f32 to vector<1x128xf32>
    %13 = arith.addf %11, %12 : vector<1x128xf32>
    %14 = math.rsqrt %13 : vector<1x128xf32>
    %c0_5 = arith.constant 0 : index
    %c0_6 = arith.constant 0 : index
    %15 = vector.load %arg2[%c0_5, %c0_6] : memref<1x128xf32, #tpu.memory_space<vmem>>, vector<1x128xf32>
    %16 = arith.mulf %14, %15 : vector<1x128xf32>
    %17 = vector.broadcast %16 : vector<1x128xf32> to vector<784x128xf32>
    %18 = arith.mulf %6, %17 : vector<784x128xf32>
    %c0_7 = arith.constant 0 : index
    %c0_8 = arith.constant 0 : index
    %19 = vector.load %arg3[%c0_7, %c0_8] : memref<1x128xf32, #tpu.memory_space<vmem>>, vector<1x128xf32>
    %20 = vector.broadcast %19 : vector<1x128xf32> to vector<784x128xf32>
    %21 = arith.addf %18, %20 : vector<784x128xf32>
    %c0_9 = arith.constant 0 : index
    %c0_10 = arith.constant 0 : index
    %22 = vector.load %arg4[%c0_9, %c0_10] : memref<784x128xf32, #tpu.memory_space<vmem>>, vector<784x128xf32>
    tpu.vector_store %arg4[%c0_9, %c0_10], %21 {strides = array<i32>} : memref<784x128xf32, #tpu.memory_space<vmem>>, vector<784x128xf32>,
    return
  }
  func.func @transform_0(%arg0: i32) -> (i32, i32) {
    %c0_i32 = arith.constant 0 : i32
    %c0_i32_0 = arith.constant 0 : i32
    return %c0_i32, %arg0 : i32, i32
  }
  func.func @transform_1(%arg0: i32) -> (i32, i32) {
    %c0_i32 = arith.constant 0 : i32
    %c0_i32_0 = arith.constant 0 : i32
    return %c0_i32, %arg0 : i32, i32
  }
  func.func @transform_2(%arg0: i32) -> (i32, i32) {
    %c0_i32 = arith.constant 0 : i32
    %c0_i32_0 = arith.constant 0 : i32
    return %c0_i32, %arg0 : i32, i32
  }
  func.func @transform_3(%arg0: i32) -> (i32, i32) {
    %c0_i32 = arith.constant 0 : i32
    %c0_i32_0 = arith.constant 0 : i32
    return %c0_i32, %arg0 : i32, i32
  }
}

</mosaic_0001>

<bundles_post_ra>
// kernel: tpu_custom_call.1
= control target key start
LH: loop header
LB: loop body
LE: loop exit
PB: predicated region body
PF: predicated region fallthrough
CT: control target
= control target key end

     0   :  { %s3021_s0 = inlined_call_operand.hbm [shape: f32[784,512], index: 0, kind: input, shape index: {}]   ;;  %s3022_s1 = inlined_call_operand.hbm [shape: f32[1,512], index: 1, kind: input, shape index: {}]   ;;  %s3023_s2 = inlined_call_operand.hbm [shape: f32[1,512], index: 2, kind: input, shape index: {}]   ;;  %s3024_s3 = inlined_call_operand.hbm [shape: f32[784,512], index: 3, kind: output, shape index: {}]  }
   0x1   :  { %3132 = sst [smem:[#allocation71_spill]] %s3021_s0 }
   0x2   :  { %3133 = sst [smem:[#allocation72_spill]] %s3022_s1 }
   0x3   :  { %8 = vsyncpa [#allocation3], 0 }
   0x4   :  { %10 = vsyncpa [#allocation3 + $0x1], 0 }
   0x5   :  { %11 = vsyncpa [#allocation6], 0 }
   0x6   :  { %13 = vsyncpa [#allocation6 + $0x1], 0 }
   0x7   :  { %14 = vsyncpa [#allocation4], 0 }
   0x8   :  { %16 = vsyncpa [#allocation4 + $0x1], 0  ;;  %s1456_s12 = smov 0   ;;  %s1458_s13 = smov 0  }
   0x9   :  { %s1460_s14 = smov 0   ;;  %s1462_s15 = smov 0  }
   0xa LB: > { %s1477_s16 = sadd.s32 4294967295, %s1424_s15   ;;  %s1187_s17 = sadd.s32 4294967294, %s1424_s15   ;;  %s1424_s15 = sphi %s1462_s15, %s3358_s15   ;;  %s1420_s14 = sphi %s1460_s14, %s3357_s14   ;;  %s1416_s13 = sphi %s1458_s13, %s3356_s13   ;;  %s1412_s12 = sphi %s1456_s12, %s3355_s12  }
   0xb   : > { %s1481_s18 = sadd.s32 1, %s1424_s15   ;;  %s29_s19 = sadd.s32 1, %s1420_s14 }
   0xc   : > { %s26_s20 = ssub.s32 %s1424_s15, %s1481_s18  ;;  %p36_p0 = scmp.ne.s32.totalorder %s1420_s14, %s1416_s13 }
   0xd   : > { %p27_p1 = scmp.eq.s32.totalorder %s26_s20, 0  ;;  %p37_p2 = scmp.eq.s32.totalorder %s1424_s15, 0 }
   0xe   : > { %p42_p3 = scmp.ne.s32.totalorder %s1416_s13, %s1412_s12  ;;  %p43_p4 = scmp.eq.s32.totalorder %s1477_s16, 0 }
   0xf   : > { %s1493_s21 = scalar_select %p27_p1, %s1420_s14, %s29_s19  }
  0x10   : > { %p38_p5 = por %p37_p2, %p36_p0  ;;  %p1495_p6 = por %p43_p4, %p42_p3 }
  0x11   : > { %p118_p7 = scmp.eq.s32.totalorder %s1477_s16, 3  ;;  %p124_p8 = scmp.eq.s32.totalorder %s1187_s17, 3 }
  0x12   : > { %s3134_s22 = scalar_select %p1495_p6, 1, 0 }
  0x13   : > { %p1222_p9 = scmp.lt.s32.totalorder %s1424_s15, 4  ;;  %p1501_p10 = por %p118_p7, %p36_p0 }
  0x14   : > { %p1505_p11 = por %p124_p8, %p42_p3  ;;  %s1510_s25 = sand.u32 1, %s1420_s14  }
  0x15   : > { %s3135_s23 = scalar_select %p1501_p10, 1, 0 }
  0x16   : > { %s3136_s24 = scalar_select %p1505_p11, 1, 0 }
  0x17   : > { %p1512_p12 = pnand %p1222_p9, %p38_p5  ;;  %s1198_s27 = smul.u32 784, %s1510_s25 }
  0x18   : > { %s164_s28 = sand.u32 1, %s1424_s15   ;;  %s1191_s29 = sshll.u32 %s1424_s15, 4 }
  0x19   : > { %s3137_s26 = scalar_select %p1512_p12, 1, 0 }
  0x1a   : > { %s3138_s1 = sld [smem:[#allocation72_spill]]  ;;  %s167_s6 = scalar_lea.vmem [#allocation5], %s1510_s25 }
  0x1b   : > { %s174_s7 = sshll.u32 %s167_s6, 4  ;;  %s1529_s8 = scalar_lea.sflag [#allocation6], %s164_s28  ;;  %s1527_s7 = int_to_ptr.vmem [resolvable:$true] %s174_s7 }
  0x1c   : > { %p1535_p0 = pneg %p1512_p12 }
  0x20   : > { %s1524_s5 = scalar_lea.hbm %s3138_s1, %s1191_s29  ;;  %s1269_s19 = scalar_lea.hbm %s3138_s1, 64 }
  0x21   : > { %s1264_s9 = scalar_lea.hbm %s1524_s5, 16  ;;  %p1270_p3 = scmp.lt.u32.totalorder %s1524_s5, %s3138_s1 }
  0x22   : > { %p1265_p13 = scmp.ne.s32.totalorder %s1524_s5, %s1264_s9  ;;  %p1271_p4 = scmp.lt.u32.totalorder %s1269_s19, %s1264_s9 }
  0x23   : > { %p1273_p7 = scmp.lt.u32.totalorder %s1264_s9, %s1524_s5 }
  0x24   : > { %p1267_p1 = pnand %p1535_p0, %p1265_p13  ;;  %p1272_p5 = por %p1271_p4, %p1270_p3 }
  0x26   : > { %p1268_p2 = pneg %p1267_p1  ;;  %p1274_p8 = por %p1273_p7, %p1272_p5 }
  0x28   : > { %p1275_p9 = pnand %p1274_p8, %p1268_p2 }
  0x2a   : > { %1278 = shalt.err (!%p1275_p9)
}
  0x2b   : > { %s1279_s28 = scalar_lea.vmem %s1527_s7, 16  ;;  %s1426_s4 = smov [#allocation5]  }
  0x2c   : > { %p1280_p13 = scmp.ne.s32.totalorder %s1527_s7, %s1279_s28  ;;  %s1284_s6 = sshll.u32 %s1426_s4, 4  ;;  %s1285_s6 = int_to_ptr.vmem [resolvable:$false] %s1284_s6 }
  0x2d   : > { %s1286_s11 = scalar_lea.vmem %s1285_s6, 32  ;;  %p1287_p10 = scmp.lt.s32.totalorder %s1527_s7, %s1285_s6 }
  0x2e   : > { %p1282_p1 = pnand %p1280_p13, %p1535_p0  ;;  %p1288_p6 = scmp.lt.s32.totalorder %s1286_s11, %s1279_s28 }
  0x30   : > { %p1283_p11 = pneg %p1282_p1  ;;  %p1289_p3 = por %p1288_p6, %p1287_p10 }
  0x32   : > { %p1290_p4 = pnand %p1289_p3, %p1283_p11 }
  0x34   : > { %1293 = shalt.err (!%p1290_p4)
}
  0x35   : > { %1214 = dma.hbm_to_vmem [thread:$0]  (!%p1512_p12), %s1524_s5, 16, %s1527_s7, %s1529_s8  }
  0x36   : > { %p1193_p2 = scmp.ge.s32.totalorder %s1424_s15, 1  ;;  %p196_p5 = scmp.lt.s32.totalorder %s1424_s15, 5 }
  0x37   : > { %s1190_s17 = sshll.u32 %s1424_s15, 7  ;;  %s3141_s0 = sld [smem:[#allocation71_spill]] }
  0x38   : > { %p1561_p7 = pnand %p1193_p2, %p196_p5  ;;  %s148_s28 = scalar_lea.vmem [#allocation2], %s1198_s27 }
  0x39   : > { %s154_s4 = sshll.u32 %s148_s28, 4  ;;  %s145_s5 = scalar_lea.sflag [#allocation3], %s1510_s25  ;;  %s1573_s4 = int_to_ptr.vmem [resolvable:$true] %s154_s4 }
  0x3a   : > { %s3140_s9 = scalar_select %p1561_p7, 1, 0 }
  0x3d   : > { %s1569_s30 = scalar_lea.hbm %s3141_s0, %s1190_s17  ;;  %s1299_s17 = scalar_lea.hbm %s3141_s0, 50176 }
  0x3e   : > { %s1294_s7 = scalar_lea.hbm %s1569_s30, 12544  ;;  %p1300_p8 = scmp.lt.u32.totalorder %s1569_s30, %s3141_s0 }
  0x3f   : > { %p1295_p6 = scmp.ne.s32.totalorder %s1569_s30, %s1294_s7  ;;  %p1301_p9 = scmp.lt.u32.totalorder %s1299_s17, %s1294_s7 }
  0x40   : > { %p1303_p1 = scmp.lt.u32.totalorder %s1294_s7, %s1569_s30 }
  0x41   : > { %p1297_p10 = pnand %p1295_p6, %p1535_p0  ;;  %p1302_p13 = por %p1301_p9, %p1300_p8 }
  0x43   : > { %p1298_p11 = pneg %p1297_p10  ;;  %p1304_p3 = por %p1303_p1, %p1302_p13 }
  0x45   : > { %p1305_p4 = pnand %p1304_p3, %p1298_p11 }
  0x47   : > { %1308 = shalt.err (!%p1305_p4)
}
  0x48   : > { %s1309_s27 = scalar_lea.vmem %s1573_s4, 12544  ;;  %s1427_s28 = smov [#allocation2]  }
  0x49   : > { %p1310_p2 = scmp.ne.s32.totalorder %s1573_s4, %s1309_s27  ;;  %s1314_s6 = sshll.u32 %s1427_s28, 4  ;;  %s1315_s6 = int_to_ptr.vmem [resolvable:$false] %s1314_s6 }
  0x4a   : > { %s1316_s11 = scalar_lea.vmem %s1315_s6, 25088  ;;  %p1317_p10 = scmp.lt.s32.totalorder %s1573_s4, %s1315_s6 }
  0x4b   : > { %p1312_p5 = pnand %p1310_p2, %p1535_p0  ;;  %p1318_p7 = scmp.lt.s32.totalorder %s1316_s11, %s1309_s27 }
  0x4d   : > { %p1313_p6 = pneg %p1312_p5  ;;  %p1319_p8 = por %p1318_p7, %p1317_p10 }
  0x4f   : > { %p1320_p9 = pnand %p1319_p8, %p1313_p6 }
  0x51   : > { %1323 = shalt.err (!%p1320_p9)
}
  0x52   : > { %s1428_s7 = smov 512   ;;  %s1429_s17 = smov 128  }
  0x53   : > { %s1430_s19 = smov 8   ;;  %s1604_s27 = scalar_lea.hbm %s3023_s2, %s1191_s29 }
  0x54   : > { %1211 = dma.hbm_to_vmem [thread:$0]  (!%p1512_p12), %s1569_s30, 12544, %s1573_s4, %s145_s5, %s1428_s7, %s1429_s17, %s1430_s19  }
  0x55   : > { %s184_s6 = scalar_lea.vmem [#allocation7], %s1510_s25  ;;  %s1324_s0 = scalar_lea.hbm %s1604_s27, 16 }
  0x56   : > { %s191_s11 = sshll.u32 %s184_s6, 4  ;;  %p1325_p7 = scmp.ne.s32.totalorder %s1604_s27, %s1324_s0  ;;  %s192_s11 = int_to_ptr.vmem [resolvable:$true] %s191_s11 }
  0x57   : > { %s1329_s4 = scalar_lea.hbm %s3023_s2, 64  ;;  %p1330_p1 = scmp.lt.u32.totalorder %s1604_s27, %s3023_s2 }
  0x58   : > { %p1327_p11 = pnand %p1325_p7, %p1535_p0  ;;  %p1331_p3 = scmp.lt.u32.totalorder %s1329_s4, %s1324_s0 }
  0x59   : > { %p1333_p2 = scmp.lt.u32.totalorder %s1324_s0, %s1604_s27 }
  0x5a   : > { %p1328_p13 = pneg %p1327_p11  ;;  %p1332_p4 = por %p1331_p3, %p1330_p1 }
  0x5c   : > { %p1334_p5 = por %p1333_p2, %p1332_p4 }
  0x5e   : > { %p1335_p6 = pnand %p1334_p5, %p1328_p13 }
  0x60   : > { %1338 = shalt.err (!%p1335_p6)
}
  0x61   : > { %s1339_s25 = scalar_lea.vmem %s192_s11, 16  ;;  %s1431_s29 = smov [#allocation7]  }
  0x62   : > { %p1340_p10 = scmp.ne.s32.totalorder %s192_s11, %s1339_s25  ;;  %s1344_s17 = sshll.u32 %s1431_s29, 4  ;;  %s1345_s17 = int_to_ptr.vmem [resolvable:$false] %s1344_s17 }
  0x63   : > { %s1346_s1 = scalar_lea.vmem %s1345_s17, 32  ;;  %p1347_p7 = scmp.lt.s32.totalorder %s192_s11, %s1345_s17 }
  0x64   : > { %p1342_p8 = pnand %p1340_p10, %p1535_p0  ;;  %p1348_p11 = scmp.lt.s32.totalorder %s1346_s1, %s1339_s25 }
  0x66   : > { %p1343_p9 = pneg %p1342_p8  ;;  %p1349_p12 = por %p1348_p11, %p1347_p7 }
  0x68   : > { %p1350_p1 = pnand %p1349_p12, %p1343_p9 }
  0x6a   : > { %1353 = shalt.err (!%p1350_p1)
}
  0x6b   : > { %p3142_p3 = scmp.ne.s32.totalorder %s3137_s26, 0  ;;  %p3143_p13 = scmp.ne.s32.totalorder %s3140_s9, 0 }
  0x6d   : > { %1217 = dma.hbm_to_vmem [thread:$0]  (!%p3142_p3), %s1604_s27, 16, %s192_s11, %s1529_s8  }
  0x6e   : > { %200 = sbr.rel (%p3143_p13) target bundleno = 646 (0x286), region = 32 }
  0x75   : > { %s1628_s0 = sand.u32 1, %s1416_s13   ;;  %p3144_p12 = scmp.ne.s32.totalorder %s3134_s22, 0 }
  0x76   : > { %s1199_s10 = smul.u32 784, %s1628_s0  ;;  %s203_s19 = scalar_lea.sflag [#allocation3], %s1628_s0 }
  0x78   : > { %s1634_s20 = scalar_lea.vmem [#allocation2], %s1199_s10 }
  0x79   : > { %1399 = dma.done.wait (%p3144_p12), %s203_s19, 12544  }
  0x7a   : > { %1401 = vsyncadd (%p3144_p12), %s203_s19, 4294954752  ;;  %s211_s26 = sand.u32 1, %s1477_s16   ;;  %s214_s9 = scalar_lea.vmem [#allocation5], %s1628_s0 }
  0x7b   : > { %s212_s8 = scalar_lea.sflag [#allocation6], %s211_s26 }
  0x7c   : > { %1403 = dma.done.wait (%p3144_p12), %s212_s8, 32  }
  0x7d   : > { %1405 = vsyncadd (%p3144_p12), %s212_s8, 4294967264  ;;  %v1647_v0 = vld [vmem:[%s1634_s20] sm:$0xff]  ;;  %v1650_v1 = vld [vmem:[%s1634_s20 + $0x8] sm:$0xff]  ;;  %s222_s22 = scalar_lea.vmem [#allocation7], %s1628_s0  ;;  %s2601_s28 = scalar_lea.vmem [#allocation8], %s1199_s10 }
  0x7e   : > { %v1653_v2 = vld [vmem:[%s1634_s20 + $0x10] sm:$0xff]  ;;  %v351_v3 = vadd.f32 %v1650_v1, %v1647_v0  ;;  %v1658_v4 = vld [vmem:[%s1634_s20 + $0x18] sm:$0xff]  ;;  %v1662_v6 = vld [vmem:[%s1634_s20 + $0x20] sm:$0xff]  ;;  %s1195_s27 = sshll.u32 %s1477_s16, 7  ;;  %s1077_s6 = sshll.u32 %s2601_s28, 4  ;;  %s2974_s6 = int_to_ptr.vmem [resolvable:$true] %s1077_s6 }
  0x7f   : > { %v1666_v8 = vld [vmem:[%s1634_s20 + $0x28] sm:$0xff]  ;;  %v1670_v10 = vld [vmem:[%s1634_s20 + $0x30] sm:$0xff]  ;;  %v1674_v12 = vld [vmem:[%s1634_s20 + $0x38] sm:$0xff]  ;;  %s2968_s30 = scalar_lea.hbm %s3024_s3, %s1195_s27  ;;  %s1065_s4 = scalar_lea.sflag [#allocation4], %s1628_s0 }
  0x80   : > { %v352_v5 = vadd.f32 %v351_v3, %v1653_v2  ;;  %v1678_v14 = vld [vmem:[%s1634_s20 + $0x40] sm:$0xff]  ;;  %v1682_v16 = vld [vmem:[%s1634_s20 + $0x48] sm:$0xff]  ;;  %v1686_v18 = vld [vmem:[%s1634_s20 + $0x50] sm:$0xff]  ;;  %s1354_s5 = scalar_lea.vmem %s2974_s6, 12544  ;;  %p3353_p4 = scmp.ne.s32.totalorder %s3135_s23, 0 }
  0x81   : > { %v1690_v20 = vld [vmem:[%s1634_s20 + $0x58] sm:$0xff]  ;;  %v1694_v22 = vld [vmem:[%s1634_s20 + $0x60] sm:$0xff]  ;;  %v1698_v24 = vld [vmem:[%s1634_s20 + $0x68] sm:$0xff]  ;;  %p1355_p0 = scmp.ne.s32.totalorder %s2974_s6, %s1354_s5  ;;  %s1432_s7 = smov [#allocation8]  }
  0x82   : > { %v353_v7 = vadd.f32 %v352_v5, %v1658_v4  ;;  %v1702_v26 = vld [vmem:[%s1634_s20 + $0x70] sm:$0xff]  ;;  %v1706_v28 = vld [vmem:[%s1634_s20 + $0x78] sm:$0xff]  ;;  %v1710_v30 = vld [vmem:[%s1634_s20 + $0x80] sm:$0xff]  ;;  %s1358_s25 = sshll.u32 %s1432_s7, 4  ;;  %s1359_s25 = int_to_ptr.vmem [resolvable:$false] %s1358_s25 }
  0x83   : > { %v1714_v32 = vld [vmem:[%s1634_s20 + $0x88] sm:$0xff]  ;;  %v1718_v34 = vld [vmem:[%s1634_s20 + $0x90] sm:$0xff]  ;;  %v1722_v36 = vld [vmem:[%s1634_s20 + $0x98] sm:$0xff]  ;;  %p1356_p2 = pnand %p1355_p0, %p3353_p4  ;;  %s1360_s29 = scalar_lea.vmem %s1359_s25, 25088 }
  0x84   : > { %v354_v9 = vadd.f32 %v353_v7, %v1662_v6  ;;  %v1726_v38 = vld [vmem:[%s1634_s20 + $0xa0] sm:$0xff]  ;;  %v1730_v40 = vld [vmem:[%s1634_s20 + $0xa8] sm:$0xff]  ;;  %v1734_v42 = vld [vmem:[%s1634_s20 + $0xb0] sm:$0xff]  ;;  %p1361_p6 = scmp.lt.s32.totalorder %s2974_s6, %s1359_s25  ;;  %p1362_p10 = scmp.lt.s32.totalorder %s1360_s29, %s1354_s5 }
  0x85   : > { %v1738_v44 = vld [vmem:[%s1634_s20 + $0xb8] sm:$0xff]  ;;  %v1742_v46 = vld [vmem:[%s1634_s20 + $0xc0] sm:$0xff]  ;;  %v1746_v48 = vld [vmem:[%s1634_s20 + $0xc8] sm:$0xff]  ;;  %p1357_p5 = pneg %p1356_p2 }
  0x86   : > { %v355_v11 = vadd.f32 %v354_v9, %v1666_v8  ;;  %v1750_v50 = vld [vmem:[%s1634_s20 + $0xd0] sm:$0xff]  ;;  %v1754_v52 = vld [vmem:[%s1634_s20 + $0xd8] sm:$0xff]  ;;  %v1758_v54 = vld [vmem:[%s1634_s20 + $0xe0] sm:$0xff]  ;;  %p1363_p8 = por %p1362_p10, %p1361_p6 }
  0x87   : > { %v1762_v56 = vld [vmem:[%s1634_s20 + $0xe8] sm:$0xff]  ;;  %v1766_v58 = vld [vmem:[%s1634_s20 + $0xf0] sm:$0xff]  ;;  %v1770_v60 = vld [vmem:[%s1634_s20 + $0xf8] sm:$0xff] }
  0x88   : > { %v356_v13 = vadd.f32 %v355_v11, %v1670_v10  ;;  %v1774_v62 = vld [vmem:[%s1634_s20 + $0x100] sm:$0xff]  ;;  %v1778_v3 = vld [vmem:[%s1634_s20 + $0x108] sm:$0xff]  ;;  %v1782_v7 = vld [vmem:[%s1634_s20 + $0x110] sm:$0xff]  ;;  %p1364_p9 = pnand %p1363_p8, %p1357_p5 }
  0x89   : > { %3145 = vst [vmem:[#allocation12_spill] sm:$0xff] %v1782_v7  ;;  %v1786_v11 = vld [vmem:[%s1634_s20 + $0x118] sm:$0xff] }
  0x8a   : > { %v357_v15 = vadd.f32 %v356_v13, %v1674_v12  ;;  %3146 = vst [vmem:[#allocation13_spill] sm:$0xff] %v1786_v11 }
  0x8c   : > { %v358_v17 = vadd.f32 %v357_v15, %v1678_v14  ;;  %v1790_v15 = vld [vmem:[%s1634_s20 + $0x120] sm:$0xff] }
  0x8d   : > { %3147 = vst [vmem:[#allocation14_spill] sm:$0xff] %v1790_v15 }
  0x8e   : > { %v359_v19 = vadd.f32 %v358_v17, %v1682_v16 }
  0x90   : > { %v360_v21 = vadd.f32 %v359_v19, %v1686_v18  ;;  %v1794_v19 = vld [vmem:[%s1634_s20 + $0x128] sm:$0xff] }
  0x91   : > { %3148 = vst [vmem:[#allocation15_spill] sm:$0xff] %v1794_v19 }
  0x92   : > { %v361_v23 = vadd.f32 %v360_v21, %v1690_v20 }
  0x94   : > { %v362_v25 = vadd.f32 %v361_v23, %v1694_v22  ;;  %v1798_v23 = vld [vmem:[%s1634_s20 + $0x130] sm:$0xff] }
  0x95   : > { %3149 = vst [vmem:[#allocation16_spill] sm:$0xff] %v1798_v23 }
  0x96   : > { %v363_v27 = vadd.f32 %v362_v25, %v1698_v24 }
  0x98   : > { %v364_v29 = vadd.f32 %v363_v27, %v1702_v26  ;;  %v1802_v27 = vld [vmem:[%s1634_s20 + $0x138] sm:$0xff] }
  0x99   : > { %3150 = vst [vmem:[#allocation17_spill] sm:$0xff] %v1802_v27 }
  0x9a   : > { %v365_v31 = vadd.f32 %v364_v29, %v1706_v28 }
  0x9c   : > { %v366_v33 = vadd.f32 %v365_v31, %v1710_v30  ;;  %v1806_v31 = vld [vmem:[%s1634_s20 + $0x140] sm:$0xff] }
  0x9d   : > { %3151 = vst [vmem:[#allocation18_spill] sm:$0xff] %v1806_v31 }
  0x9e   : > { %v367_v35 = vadd.f32 %v366_v33, %v1714_v32 }
  0xa0   : > { %v368_v37 = vadd.f32 %v367_v35, %v1718_v34  ;;  %v1810_v35 = vld [vmem:[%s1634_s20 + $0x148] sm:$0xff] }
  0xa1   : > { %3152 = vst [vmem:[#allocation19_spill] sm:$0xff] %v1810_v35 }
  0xa2   : > { %v369_v39 = vadd.f32 %v368_v37, %v1722_v36 }
  0xa4   : > { %v370_v41 = vadd.f32 %v369_v39, %v1726_v38  ;;  %v1814_v39 = vld [vmem:[%s1634_s20 + $0x150] sm:$0xff] }
  0xa5   : > { %3153 = vst [vmem:[#allocation20_spill] sm:$0xff] %v1814_v39 }
  0xa6   : > { %v371_v43 = vadd.f32 %v370_v41, %v1730_v40 }
  0xa8   : > { %v372_v45 = vadd.f32 %v371_v43, %v1734_v42  ;;  %v1818_v43 = vld [vmem:[%s1634_s20 + $0x158] sm:$0xff] }
  0xa9   : > { %3154 = vst [vmem:[#allocation21_spill] sm:$0xff] %v1818_v43 }
  0xaa   : > { %v373_v47 = vadd.f32 %v372_v45, %v1738_v44 }
  0xac   : > { %v374_v49 = vadd.f32 %v373_v47, %v1742_v46  ;;  %v1822_v47 = vld [vmem:[%s1634_s20 + $0x160] sm:$0xff] }
  0xad   : > { %3155 = vst [vmem:[#allocation22_spill] sm:$0xff] %v1822_v47 }
  0xae   : > { %v375_v51 = vadd.f32 %v374_v49, %v1746_v48 }
  0xb0   : > { %v376_v53 = vadd.f32 %v375_v51, %v1750_v50  ;;  %v1826_v51 = vld [vmem:[%s1634_s20 + $0x168] sm:$0xff] }
  0xb1   : > { %3156 = vst [vmem:[#allocation23_spill] sm:$0xff] %v1826_v51 }
  0xb2   : > { %v377_v55 = vadd.f32 %v376_v53, %v1754_v52 }
  0xb4   : > { %v378_v57 = vadd.f32 %v377_v55, %v1758_v54  ;;  %v1830_v55 = vld [vmem:[%s1634_s20 + $0x170] sm:$0xff] }
  0xb5   : > { %3157 = vst [vmem:[#allocation24_spill] sm:$0xff] %v1830_v55 }
  0xb6   : > { %v379_v59 = vadd.f32 %v378_v57, %v1762_v56 }
  0xb8   : > { %v380_v61 = vadd.f32 %v379_v59, %v1766_v58  ;;  %v1834_v59 = vld [vmem:[%s1634_s20 + $0x178] sm:$0xff] }
  0xb9   : > { %3158 = vst [vmem:[#allocation25_spill] sm:$0xff] %v1834_v59 }
  0xba   : > { %v381_v63 = vadd.f32 %v380_v61, %v1770_v60 }
  0xbc   : > { %v382_v5 = vadd.f32 %v381_v63, %v1774_v62  ;;  %v1838_v63 = vld [vmem:[%s1634_s20 + $0x180] sm:$0xff] }
  0xbd   : > { %3159 = vst [vmem:[#allocation26_spill] sm:$0xff] %v1838_v63 }
  0xbe   : > { %v383_v9 = vadd.f32 %v382_v5, %v1778_v3 }
  0xc0   : > { %v384_v13 = vadd.f32 %v383_v9, %v1782_v7  ;;  %v1842_v9 = vld [vmem:[%s1634_s20 + $0x188] sm:$0xff] }
  0xc1   : > { %3160 = vst [vmem:[#allocation27_spill] sm:$0xff] %v1842_v9 }
  0xc2   : > { %v385_v17 = vadd.f32 %v384_v13, %v1786_v11 }
  0xc4   : > { %v386_v21 = vadd.f32 %v385_v17, %v1790_v15  ;;  %v1846_v17 = vld [vmem:[%s1634_s20 + $0x190] sm:$0xff] }
  0xc5   : > { %3161 = vst [vmem:[#allocation28_spill] sm:$0xff] %v1846_v17 }
  0xc6   : > { %v387_v25 = vadd.f32 %v386_v21, %v1794_v19 }
  0xc8   : > { %v388_v29 = vadd.f32 %v387_v25, %v1798_v23  ;;  %v1850_v25 = vld [vmem:[%s1634_s20 + $0x198] sm:$0xff] }
  0xc9   : > { %3162 = vst [vmem:[#allocation29_spill] sm:$0xff] %v1850_v25 }
  0xca   : > { %v389_v33 = vadd.f32 %v388_v29, %v1802_v27 }
  0xcc   : > { %v390_v37 = vadd.f32 %v389_v33, %v1806_v31  ;;  %v1854_v33 = vld [vmem:[%s1634_s20 + $0x1a0] sm:$0xff] }
  0xcd   : > { %3163 = vst [vmem:[#allocation30_spill] sm:$0xff] %v1854_v33  ;;  %v349_v31 = vld [vmem:[%s1634_s20 + $0x300] sm:$0xff] }
  0xce   : > { %v391_v41 = vadd.f32 %v390_v37, %v1810_v35  ;;  %v348_v35 = vld [vmem:[%s1634_s20 + $0x2f8] sm:$0xff] }
  0xd0   : > { %v392_v45 = vadd.f32 %v391_v41, %v1814_v39  ;;  %v1858_v41 = vld [vmem:[%s1634_s20 + $0x1a8] sm:$0xff] }
  0xd1   : > { %3164 = vst [vmem:[#allocation31_spill] sm:$0xff] %v1858_v41 }
  0xd2   : > { %v393_v49 = vadd.f32 %v392_v45, %v1818_v43  ;;  %v347_v43 = vld [vmem:[%s1634_s20 + $0x2f0] sm:$0xff] }
  0xd4   : > { %v394_v53 = vadd.f32 %v393_v49, %v1822_v47  ;;  %v1862_v49 = vld [vmem:[%s1634_s20 + $0x1b0] sm:$0xff]  ;;  %v346_v47 = vld [vmem:[%s1634_s20 + $0x2e8] sm:$0xff] }
  0xd5   : > { %3165 = vst [vmem:[#allocation32_spill] sm:$0xff] %v1862_v49 }
  0xd6   : > { %v395_v57 = vadd.f32 %v394_v53, %v1826_v51 }
  0xd8   : > { %v396_v61 = vadd.f32 %v395_v57, %v1830_v55  ;;  %v1866_v57 = vld [vmem:[%s1634_s20 + $0x1b8] sm:$0xff] }
  0xd9   : > { %3166 = vst [vmem:[#allocation33_spill] sm:$0xff] %v1866_v57 }
  0xda   : > { %v397_v5 = vadd.f32 %v396_v61, %v1834_v59  ;;  %v343_v59 = vld [vmem:[%s1634_s20 + $0x2d0] sm:$0xff] }
  0xdc   : > { %v398_v13 = vadd.f32 %v397_v5, %v1838_v63  ;;  %v1870_v5 = vld [vmem:[%s1634_s20 + $0x1c0] sm:$0xff] }
  0xdd   : > { %3167 = vst [vmem:[#allocation34_spill] sm:$0xff] %v1870_v5 }
  0xde   : > { %v399_v21 = vadd.f32 %v398_v13, %v1842_v9  ;;  %v340_v9 = vld [vmem:[%s1634_s20 + $0x2b8] sm:$0xff] }
  0xe0   : > { %v400_v29 = vadd.f32 %v399_v21, %v1846_v17  ;;  %v1874_v21 = vld [vmem:[%s1634_s20 + $0x1c8] sm:$0xff] }
  0xe1   : > { %3168 = vst [vmem:[#allocation35_spill] sm:$0xff] %v1874_v21 }
  0xe2   : > { %v401_v37 = vadd.f32 %v400_v29, %v1850_v25  ;;  %v338_v25 = vld [vmem:[%s1634_s20 + $0x2a8] sm:$0xff] }
  0xe4   : > { %v402_v45 = vadd.f32 %v401_v37, %v1854_v33  ;;  %v1878_v37 = vld [vmem:[%s1634_s20 + $0x1d0] sm:$0xff] }
  0xe5   : > { %3169 = vst [vmem:[#allocation36_spill] sm:$0xff] %v1878_v37 }
  0xe6   : > { %v403_v53 = vadd.f32 %v402_v45, %v1858_v41  ;;  %v1882_v41 = vld [vmem:[%s1634_s20 + $0x1d8] sm:$0xff] }
  0xe7   : > { %3170 = vst [vmem:[#allocation37_spill] sm:$0xff] %v1882_v41 }
  0xe8   : > { %v404_v61 = vadd.f32 %v403_v53, %v1862_v49  ;;  %v1886_v49 = vld [vmem:[%s1634_s20 + $0x1e0] sm:$0xff] }
  0xe9   : > { %3171 = vst [vmem:[#allocation38_spill] sm:$0xff] %v1886_v49 }
  0xea   : > { %v405_v13 = vadd.f32 %v404_v61, %v1866_v57  ;;  %v1890_v57 = vld [vmem:[%s1634_s20 + $0x1e8] sm:$0xff] }
  0xeb   : > { %3172 = vst [vmem:[#allocation39_spill] sm:$0xff] %v1890_v57 }
  0xec   : > { %v406_v29 = vadd.f32 %v405_v13, %v1870_v5  ;;  %v1894_v5 = vld [vmem:[%s1634_s20 + $0x1f0] sm:$0xff] }
  0xed   : > { %3173 = vst [vmem:[#allocation40_spill] sm:$0xff] %v1894_v5 }
  0xee   : > { %v407_v45 = vadd.f32 %v406_v29, %v1874_v21  ;;  %v1898_v21 = vld [vmem:[%s1634_s20 + $0x1f8] sm:$0xff] }
  0xef   : > { %3174 = vst [vmem:[#allocation41_spill] sm:$0xff] %v1898_v21 }
  0xf0   : > { %v408_v53 = vadd.f32 %v407_v45, %v1878_v37  ;;  %v1902_v37 = vld [vmem:[%s1634_s20 + $0x200] sm:$0xff] }
  0xf1   : > { %3175 = vst [vmem:[#allocation42_spill] sm:$0xff] %v1902_v37 }
  0xf2   : > { %v409_v61 = vadd.f32 %v408_v53, %v1882_v41  ;;  %v1906_v41 = vld [vmem:[%s1634_s20 + $0x208] sm:$0xff] }
  0xf3   : > { %3176 = vst [vmem:[#allocation43_spill] sm:$0xff] %v1906_v41 }
  0xf4   : > { %v410_v13 = vadd.f32 %v409_v61, %v1886_v49  ;;  %v1910_v49 = vld [vmem:[%s1634_s20 + $0x210] sm:$0xff] }
  0xf5   : > { %3177 = vst [vmem:[#allocation44_spill] sm:$0xff] %v1910_v49 }
  0xf6   : > { %v411_v29 = vadd.f32 %v410_v13, %v1890_v57  ;;  %v1914_v57 = vld [vmem:[%s1634_s20 + $0x218] sm:$0xff] }
  0xf7   : > { %3178 = vst [vmem:[#allocation45_spill] sm:$0xff] %v1914_v57 }
  0xf8   : > { %v412_v45 = vadd.f32 %v411_v29, %v1894_v5  ;;  %v1918_v5 = vld [vmem:[%s1634_s20 + $0x220] sm:$0xff] }
  0xf9   : > { %3179 = vst [vmem:[#allocation46_spill] sm:$0xff] %v1918_v5 }
  0xfa   : > { %v413_v53 = vadd.f32 %v412_v45, %v1898_v21  ;;  %v1922_v21 = vld [vmem:[%s1634_s20 + $0x228] sm:$0xff] }
  0xfb   : > { %3180 = vst [vmem:[#allocation47_spill] sm:$0xff] %v1922_v21 }
  0xfc   : > { %v414_v61 = vadd.f32 %v413_v53, %v1902_v37  ;;  %v1926_v37 = vld [vmem:[%s1634_s20 + $0x230] sm:$0xff] }
  0xfd   : > { %3181 = vst [vmem:[#allocation48_spill] sm:$0xff] %v1926_v37 }
  0xfe   : > { %v415_v13 = vadd.f32 %v414_v61, %v1906_v41  ;;  %v1930_v41 = vld [vmem:[%s1634_s20 + $0x238] sm:$0xff] }
  0xff   : > { %3182 = vst [vmem:[#allocation49_spill] sm:$0xff] %v1930_v41 }
 0x100   : > { %v416_v29 = vadd.f32 %v415_v13, %v1910_v49  ;;  %v1934_v49 = vld [vmem:[%s1634_s20 + $0x240] sm:$0xff] }
 0x101   : > { %3183 = vst [vmem:[#allocation50_spill] sm:$0xff] %v1934_v49 }
 0x102   : > { %v417_v45 = vadd.f32 %v416_v29, %v1914_v57  ;;  %v1938_v57 = vld [vmem:[%s1634_s20 + $0x248] sm:$0xff] }
 0x103   : > { %3184 = vst [vmem:[#allocation51_spill] sm:$0xff] %v1938_v57 }
 0x104   : > { %v418_v53 = vadd.f32 %v417_v45, %v1918_v5  ;;  %v1942_v5 = vld [vmem:[%s1634_s20 + $0x250] sm:$0xff] }
 0x105   : > { %3185 = vst [vmem:[#allocation52_spill] sm:$0xff] %v1942_v5 }
 0x106   : > { %v419_v61 = vadd.f32 %v418_v53, %v1922_v21  ;;  %v1946_v21 = vld [vmem:[%s1634_s20 + $0x258] sm:$0xff] }
 0x107   : > { %3186 = vst [vmem:[#allocation53_spill] sm:$0xff] %v1946_v21 }
 0x108   : > { %v420_v13 = vadd.f32 %v419_v61, %v1926_v37  ;;  %v1950_v37 = vld [vmem:[%s1634_s20 + $0x260] sm:$0xff] }
 0x109   : > { %3187 = vst [vmem:[#allocation54_spill] sm:$0xff] %v1950_v37 }
 0x10a   : > { %v421_v29 = vadd.f32 %v420_v13, %v1930_v41  ;;  %v1954_v41 = vld [vmem:[%s1634_s20 + $0x268] sm:$0xff] }
 0x10b   : > { %3188 = vst [vmem:[#allocation55_spill] sm:$0xff] %v1954_v41 }
 0x10c   : > { %v422_v45 = vadd.f32 %v421_v29, %v1934_v49  ;;  %v1958_v49 = vld [vmem:[%s1634_s20 + $0x270] sm:$0xff] }
 0x10d   : > { %3189 = vst [vmem:[#allocation56_spill] sm:$0xff] %v1958_v49 }
 0x10e   : > { %v423_v53 = vadd.f32 %v422_v45, %v1938_v57  ;;  %v1962_v57 = vld [vmem:[%s1634_s20 + $0x278] sm:$0xff] }
 0x10f   : > { %3190 = vst [vmem:[#allocation57_spill] sm:$0xff] %v1962_v57 }
 0x110   : > { %v424_v61 = vadd.f32 %v423_v53, %v1942_v5  ;;  %v1966_v5 = vld [vmem:[%s1634_s20 + $0x280] sm:$0xff] }
 0x111   : > { %3191 = vst [vmem:[#allocation58_spill] sm:$0xff] %v1966_v5 }
 0x112   : > { %v425_v13 = vadd.f32 %v424_v61, %v1946_v21  ;;  %v1970_v21 = vld [vmem:[%s1634_s20 + $0x288] sm:$0xff] }
 0x113   : > { %3192 = vst [vmem:[#allocation59_spill] sm:$0xff] %v1970_v21 }
 0x114   : > { %v426_v29 = vadd.f32 %v425_v13, %v1950_v37  ;;  %v1974_v37 = vld [vmem:[%s1634_s20 + $0x290] sm:$0xff] }
 0x115   : > { %3193 = vst [vmem:[#allocation60_spill] sm:$0xff] %v1974_v37 }
 0x116   : > { %v427_v45 = vadd.f32 %v426_v29, %v1954_v41  ;;  %v336_v41 = vld [vmem:[%s1634_s20 + $0x298] sm:$0xff] }
 0x118   : > { %v428_v53 = vadd.f32 %v427_v45, %v1958_v49  ;;  %v337_v45 = vld [vmem:[%s1634_s20 + $0x2a0] sm:$0xff] }
 0x11a   : > { %v429_v61 = vadd.f32 %v428_v53, %v1962_v57  ;;  %v339_v57 = vld [vmem:[%s1634_s20 + $0x2b0] sm:$0xff] }
 0x11c   : > { %v430_v13 = vadd.f32 %v429_v61, %v1966_v5  ;;  %v341_v5 = vld [vmem:[%s1634_s20 + $0x2c0] sm:$0xff] }
 0x11e   : > { %v431_v29 = vadd.f32 %v430_v13, %v1970_v21  ;;  %v342_v13 = vld [vmem:[%s1634_s20 + $0x2c8] sm:$0xff] }
 0x120   : > { %v432_v33 = vadd.f32 %v431_v29, %v1974_v37  ;;  %v344_v37 = vld [vmem:[%s1634_s20 + $0x2d8] sm:$0xff] }
 0x122   : > { %v433_v49 = vadd.f32 %v432_v33, %v336_v41  ;;  %v345_v33 = vld [vmem:[%s1634_s20 + $0x2e0] sm:$0xff] }
 0x124   : > { %v434_v53 = vadd.f32 %v433_v49, %v337_v45 }
 0x126   : > { %v435_v17 = vadd.f32 %v434_v53, %v338_v25 }
 0x128   : > { %v436_v61 = vadd.f32 %v435_v17, %v339_v57 }
 0x12a   : > { %v437_v63 = vadd.f32 %v436_v61, %v340_v9  ;;  %v350_v61 = vld [vmem:[%s1634_s20 + $0x308] sm:$0xff] }
 0x12c   : > { %v438_v21 = vadd.f32 %v437_v63, %v341_v5 }
 0x12e   : > { %v439_v29 = vadd.f32 %v438_v21, %v342_v13 }
 0x130   : > { %v440_v55 = vadd.f32 %v439_v29, %v343_v59 }
 0x132   : > { %v441_v51 = vadd.f32 %v440_v55, %v344_v37 }
 0x134   : > { %v442_v49 = vadd.f32 %v441_v51, %v345_v33 }
 0x136   : > { %v443_v39 = vadd.f32 %v442_v49, %v346_v47 }
 0x138   : > { %v444_v53 = vadd.f32 %v443_v39, %v347_v43 }
 0x13a   : > { %v445_v17 = vadd.f32 %v444_v53, %v348_v35 }
 0x13c   : > { %v446_v27 = vadd.f32 %v445_v17, %v349_v31 }
 0x13e   : > { %v447_v23 = vadd.f32 %v446_v27, %v350_v61 }
 0x140   : > { %v448_v19 = vrot.slane %v447_v23, 4 }
 0x142   : > { %v449_v63 = vadd.f32 %v448_v19, %v447_v23 }
 0x144   : > { %v450_v15 = vrot.slane %v449_v63, 2 }
 0x146   : > { %v451_v11 = vadd.f32 %v450_v15, %v449_v63 }
 0x148   : > { %v452_v21 = vrot.slane %v451_v11, 1 }
 0x14a   : > { %v453_v7 = vadd.f32 %v452_v21, %v451_v11 }
 0x14c   : > { %v1993_v29 = vmul.f32 0.0012755102, %v453_v7 }
 0x14e   : > { %v1996_v55 = vsub.f32 %v336_v41, %v1993_v29  ;;  %v1999_v51 = vsub.f32 %v337_v45, %v1993_v29  ;;  %v2002_v39 = vsub.f32 %v338_v25, %v1993_v29  ;;  %v2005_v49 = vsub.f32 %v339_v57, %v1993_v29 }
 0x14f   : > { %v2008_v19 = vsub.f32 %v340_v9, %v1993_v29  ;;  %v2011_v15 = vsub.f32 %v341_v5, %v1993_v29  ;;  %v2014_v7 = vsub.f32 %v342_v13, %v1993_v29  ;;  %v2017_v11 = vsub.f32 %v343_v59, %v1993_v29 }
 0x150   : > { %v2020_v23 = vsub.f32 %v344_v37, %v1993_v29  ;;  %v2023_v27 = vsub.f32 %v345_v33, %v1993_v29  ;;  %v2026_v25 = vsub.f32 %v346_v47, %v1993_v29  ;;  %v2029_v9 = vsub.f32 %v347_v43, %v1993_v29 }
 0x151   : > { %v2032_v41 = vsub.f32 %v348_v35, %v1993_v29  ;;  %v2035_v57 = vsub.f32 %v349_v31, %v1993_v29  ;;  %v2038_v59 = vsub.f32 %v350_v61, %v1993_v29  ;;  %v2042_v5 = vsub.f32 %v1647_v0, %v1993_v29 }
 0x152   : > { %3194 = vst [vmem:[#allocation61_spill] sm:$0xff] %v2020_v23  ;;  %3195 = vst [vmem:[#allocation62_spill] sm:$0xff] %v2023_v27  ;;  %v2046_v47 = vsub.f32 %v1650_v1, %v1993_v29  ;;  %v2050_v43 = vsub.f32 %v1653_v2, %v1993_v29  ;;  %v2054_v35 = vsub.f32 %v1658_v4, %v1993_v29 }
 0x153   : > { %3196 = vst [vmem:[#allocation63_spill] sm:$0xff] %v2026_v25  ;;  %3197 = vst [vmem:[#allocation64_spill] sm:$0xff] %v2029_v9  ;;  %v553_v31 = vmul.f32 %v2042_v5, %v2042_v5  ;;  %v2062_v0 = vsub.f32 %v1662_v6, %v1993_v29  ;;  %v2068_v2 = vsub.f32 %v1666_v8, %v1993_v29 }
 0x154   : > { %3198 = vst [vmem:[#allocation65_spill] sm:$0xff] %v2032_v41  ;;  %3199 = vst [vmem:[#allocation66_spill] sm:$0xff] %v2035_v57  ;;  %v554_v37 = vmul.f32 %v2046_v47, %v2046_v47  ;;  %v555_v1 = vmul.f32 %v2050_v43, %v2050_v43  ;;  %v556_v4 = vmul.f32 %v2054_v35, %v2054_v35 }
 0x155   : > { %3200 = vst [vmem:[#allocation67_spill] sm:$0xff] %v2038_v59  ;;  %v2074_v13 = vsub.f32 %v1670_v10, %v1993_v29  ;;  %v557_v33 = vmul.f32 %v2062_v0, %v2062_v0  ;;  %v2080_v53 = vsub.f32 %v1674_v12, %v1993_v29  ;;  %v558_v8 = vmul.f32 %v2068_v2, %v2068_v2 }
 0x156   : > { %v651_v45 = vadd.f32 %v554_v37, %v553_v31  ;;  %v2086_v61 = vsub.f32 %v1678_v14, %v1993_v29  ;;  %v2092_v21 = vsub.f32 %v1682_v16, %v1993_v29  ;;  %v2098_v37 = vsub.f32 %v1686_v18, %v1993_v29 }
 0x157   : > { %v559_v10 = vmul.f32 %v2074_v13, %v2074_v13  ;;  %v560_v12 = vmul.f32 %v2080_v53, %v2080_v53 }
 0x158   : > { %v652_v6 = vadd.f32 %v651_v45, %v555_v1  ;;  %v561_v14 = vmul.f32 %v2086_v61, %v2086_v61  ;;  %v562_v16 = vmul.f32 %v2092_v21, %v2092_v21  ;;  %v563_v18 = vmul.f32 %v2098_v37, %v2098_v37 }
 0x15a   : > { %v653_v17 = vadd.f32 %v652_v6, %v556_v4  ;;  %v2104_v4 = vsub.f32 %v1690_v20, %v1993_v29 }
 0x15c   : > { %v654_v63 = vadd.f32 %v653_v17, %v557_v33  ;;  %v2110_v33 = vsub.f32 %v1694_v22, %v1993_v29  ;;  %v564_v20 = vmul.f32 %v2104_v4, %v2104_v4 }
 0x15e   : > { %v655_v31 = vadd.f32 %v654_v63, %v558_v8  ;;  %v2116_v8 = vsub.f32 %v1698_v24, %v1993_v29  ;;  %v565_v22 = vmul.f32 %v2110_v33, %v2110_v33 }
 0x160   : > { %v656_v1 = vadd.f32 %v655_v31, %v559_v10  ;;  %v2122_v10 = vsub.f32 %v1702_v26, %v1993_v29  ;;  %v566_v24 = vmul.f32 %v2116_v8, %v2116_v8 }
 0x162   : > { %v657_v45 = vadd.f32 %v656_v1, %v560_v12  ;;  %v2128_v12 = vsub.f32 %v1706_v28, %v1993_v29  ;;  %v567_v26 = vmul.f32 %v2122_v10, %v2122_v10 }
 0x164   : > { %v658_v6 = vadd.f32 %v657_v45, %v561_v14  ;;  %v2134_v14 = vsub.f32 %v1710_v30, %v1993_v29  ;;  %v568_v28 = vmul.f32 %v2128_v12, %v2128_v12 }
 0x166   : > { %v659_v17 = vadd.f32 %v658_v6, %v562_v16  ;;  %v2140_v16 = vsub.f32 %v1714_v32, %v1993_v29  ;;  %v569_v30 = vmul.f32 %v2134_v14, %v2134_v14 }
 0x168   : > { %v660_v63 = vadd.f32 %v659_v17, %v563_v18  ;;  %v2146_v18 = vsub.f32 %v1718_v34, %v1993_v29  ;;  %v570_v32 = vmul.f32 %v2140_v16, %v2140_v16 }
 0x16a   : > { %v661_v31 = vadd.f32 %v660_v63, %v564_v20  ;;  %v2152_v20 = vsub.f32 %v1722_v36, %v1993_v29  ;;  %v571_v34 = vmul.f32 %v2146_v18, %v2146_v18 }
 0x16c   : > { %v662_v1 = vadd.f32 %v661_v31, %v565_v22  ;;  %v2158_v22 = vsub.f32 %v1726_v38, %v1993_v29  ;;  %v572_v36 = vmul.f32 %v2152_v20, %v2152_v20 }
 0x16e   : > { %v663_v45 = vadd.f32 %v662_v1, %v566_v24  ;;  %v2164_v24 = vsub.f32 %v1730_v40, %v1993_v29  ;;  %v573_v38 = vmul.f32 %v2158_v22, %v2158_v22 }
 0x170   : > { %v664_v6 = vadd.f32 %v663_v45, %v567_v26  ;;  %v2170_v26 = vsub.f32 %v1734_v42, %v1993_v29  ;;  %v574_v40 = vmul.f32 %v2164_v24, %v2164_v24 }
 0x172   : > { %v665_v17 = vadd.f32 %v664_v6, %v568_v28  ;;  %v2176_v28 = vsub.f32 %v1738_v44, %v1993_v29  ;;  %v575_v42 = vmul.f32 %v2170_v26, %v2170_v26 }
 0x174   : > { %v666_v63 = vadd.f32 %v665_v17, %v569_v30  ;;  %v2182_v30 = vsub.f32 %v1742_v46, %v1993_v29  ;;  %v576_v44 = vmul.f32 %v2176_v28, %v2176_v28 }
 0x176   : > { %v667_v31 = vadd.f32 %v666_v63, %v570_v32  ;;  %v2188_v32 = vsub.f32 %v1746_v48, %v1993_v29  ;;  %v577_v46 = vmul.f32 %v2182_v30, %v2182_v30 }
 0x178   : > { %v668_v1 = vadd.f32 %v667_v31, %v571_v34  ;;  %v2194_v34 = vsub.f32 %v1750_v50, %v1993_v29  ;;  %v578_v48 = vmul.f32 %v2188_v32, %v2188_v32 }
 0x17a   : > { %v669_v45 = vadd.f32 %v668_v1, %v572_v36  ;;  %v2200_v36 = vsub.f32 %v1754_v52, %v1993_v29  ;;  %v579_v50 = vmul.f32 %v2194_v34, %v2194_v34 }
 0x17c   : > { %v670_v6 = vadd.f32 %v669_v45, %v573_v38  ;;  %v2206_v38 = vsub.f32 %v1758_v54, %v1993_v29  ;;  %v580_v52 = vmul.f32 %v2200_v36, %v2200_v36 }
 0x17e   : > { %v671_v17 = vadd.f32 %v670_v6, %v574_v40  ;;  %v2212_v40 = vsub.f32 %v1762_v56, %v1993_v29  ;;  %v581_v54 = vmul.f32 %v2206_v38, %v2206_v38 }
 0x180   : > { %v672_v63 = vadd.f32 %v671_v17, %v575_v42  ;;  %v2218_v42 = vsub.f32 %v1766_v58, %v1993_v29  ;;  %v582_v56 = vmul.f32 %v2212_v40, %v2212_v40 }
 0x182   : > { %v673_v31 = vadd.f32 %v672_v63, %v576_v44  ;;  %v2224_v44 = vsub.f32 %v1770_v60, %v1993_v29  ;;  %v583_v58 = vmul.f32 %v2218_v42, %v2218_v42 }
 0x184   : > { %v674_v1 = vadd.f32 %v673_v31, %v577_v46  ;;  %3201 = vst [vmem:[#allocation68_spill] sm:$0xff] %v2224_v44  ;;  %v2230_v46 = vsub.f32 %v1774_v62, %v1993_v29  ;;  %v584_v60 = vmul.f32 %v2224_v44, %v2224_v44 }
 0x186   : > { %v675_v45 = vadd.f32 %v674_v1, %v578_v48  ;;  %3202 = vst [vmem:[#allocation69_spill] sm:$0xff] %v2230_v46  ;;  %v2236_v48 = vsub.f32 %v1778_v3, %v1993_v29  ;;  %v585_v62 = vmul.f32 %v2230_v46, %v2230_v46 }
 0x188   : > { %v676_v6 = vadd.f32 %v675_v45, %v579_v50  ;;  %3203 = vst [vmem:[#allocation70_spill] sm:$0xff] %v2236_v48  ;;  %v3204_v50 = vld [vmem:[#allocation12_spill] sm:$0xff]  ;;  %v3206_v45 = vld [vmem:[#allocation13_spill] sm:$0xff]  ;;  %v586_v3 = vmul.f32 %v2236_v48, %v2236_v48 }
 0x189   : > { %v2242_v1 = vsub.f32 %v3204_v50, %v1993_v29  ;;  %v3210_v50 = vld [vmem:[#allocation15_spill] sm:$0xff] }
 0x18a   : > { %v677_v17 = vadd.f32 %v676_v6, %v580_v52  ;;  %v2248_v6 = vsub.f32 %v3206_v45, %v1993_v29  ;;  %v2260_v46 = vsub.f32 %v3210_v50, %v1993_v29  ;;  %v3212_v45 = vld [vmem:[#allocation16_spill] sm:$0xff]  ;;  %v3216_v50 = vld [vmem:[#allocation18_spill] sm:$0xff] }
 0x18b   : > { %3205 = vst [vmem:[#allocation12_spill] sm:$0xff] %v2242_v1  ;;  %v2266_v48 = vsub.f32 %v3212_v45, %v1993_v29  ;;  %v3218_v45 = vld [vmem:[#allocation19_spill] sm:$0xff] }
 0x18c   : > { %v678_v63 = vadd.f32 %v677_v17, %v581_v54  ;;  %3207 = vst [vmem:[#allocation13_spill] sm:$0xff] %v2248_v6  ;;  %v3208_v17 = vld [vmem:[#allocation14_spill] sm:$0xff]  ;;  %3211 = vst [vmem:[#allocation15_spill] sm:$0xff] %v2260_v46 }
 0x18d   : > { %v2254_v44 = vsub.f32 %v3208_v17, %v1993_v29  ;;  %3213 = vst [vmem:[#allocation16_spill] sm:$0xff] %v2266_v48  ;;  %v3214_v17 = vld [vmem:[#allocation17_spill] sm:$0xff] }
 0x18e   : > { %v679_v31 = vadd.f32 %v678_v63, %v582_v56  ;;  %v587_v56 = vmul.f32 %v2242_v1, %v2242_v1  ;;  %v2272_v1 = vsub.f32 %v3214_v17, %v1993_v29  ;;  %v3220_v17 = vld [vmem:[#allocation20_spill] sm:$0xff] }
 0x18f   : > { %3209 = vst [vmem:[#allocation14_spill] sm:$0xff] %v2254_v44 }
 0x190   : > { %v680_v52 = vadd.f32 %v679_v31, %v583_v58  ;;  %v588_v58 = vmul.f32 %v2248_v6, %v2248_v6  ;;  %3215 = vst [vmem:[#allocation17_spill] sm:$0xff] %v2272_v1  ;;  %v2278_v6 = vsub.f32 %v3216_v50, %v1993_v29  ;;  %v3222_v50 = vld [vmem:[#allocation21_spill] sm:$0xff] }
 0x192   : > { %v681_v54 = vadd.f32 %v680_v52, %v584_v60  ;;  %v589_v60 = vmul.f32 %v2254_v44, %v2254_v44  ;;  %3217 = vst [vmem:[#allocation18_spill] sm:$0xff] %v2278_v6  ;;  %v2284_v44 = vsub.f32 %v3218_v45, %v1993_v29  ;;  %v3224_v45 = vld [vmem:[#allocation22_spill] sm:$0xff] }
 0x194   : > { %v682_v63 = vadd.f32 %v681_v54, %v585_v62  ;;  %v590_v62 = vmul.f32 %v2260_v46, %v2260_v46  ;;  %3219 = vst [vmem:[#allocation19_spill] sm:$0xff] %v2284_v44  ;;  %v2290_v46 = vsub.f32 %v3220_v17, %v1993_v29  ;;  %v3226_v17 = vld [vmem:[#allocation23_spill] sm:$0xff] }
 0x196   : > { %v683_v31 = vadd.f32 %v682_v63, %v586_v3  ;;  %v591_v3 = vmul.f32 %v2266_v48, %v2266_v48  ;;  %3221 = vst [vmem:[#allocation20_spill] sm:$0xff] %v2290_v46  ;;  %v2296_v48 = vsub.f32 %v3222_v50, %v1993_v29  ;;  %v3228_v50 = vld [vmem:[#allocation24_spill] sm:$0xff] }
 0x198   : > { %v684_v52 = vadd.f32 %v683_v31, %v587_v56  ;;  %v592_v56 = vmul.f32 %v2272_v1, %v2272_v1  ;;  %3223 = vst [vmem:[#allocation21_spill] sm:$0xff] %v2296_v48  ;;  %v2302_v1 = vsub.f32 %v3224_v45, %v1993_v29  ;;  %v3230_v45 = vld [vmem:[#allocation25_spill] sm:$0xff] }
 0x19a   : > { %v685_v54 = vadd.f32 %v684_v52, %v588_v58  ;;  %v593_v58 = vmul.f32 %v2278_v6, %v2278_v6  ;;  %3225 = vst [vmem:[#allocation22_spill] sm:$0xff] %v2302_v1  ;;  %v2308_v6 = vsub.f32 %v3226_v17, %v1993_v29  ;;  %v3232_v17 = vld [vmem:[#allocation26_spill] sm:$0xff] }
 0x19c   : > { %v686_v63 = vadd.f32 %v685_v54, %v589_v60  ;;  %v594_v60 = vmul.f32 %v2284_v44, %v2284_v44  ;;  %3227 = vst [vmem:[#allocation23_spill] sm:$0xff] %v2308_v6  ;;  %v2314_v44 = vsub.f32 %v3228_v50, %v1993_v29  ;;  %v3234_v50 = vld [vmem:[#allocation27_spill] sm:$0xff] }
 0x19e   : > { %v687_v31 = vadd.f32 %v686_v63, %v590_v62  ;;  %v595_v62 = vmul.f32 %v2290_v46, %v2290_v46  ;;  %3229 = vst [vmem:[#allocation24_spill] sm:$0xff] %v2314_v44  ;;  %v2320_v46 = vsub.f32 %v3230_v45, %v1993_v29  ;;  %v3236_v45 = vld [vmem:[#allocation28_spill] sm:$0xff] }
 0x1a0   : > { %v688_v52 = vadd.f32 %v687_v31, %v591_v3  ;;  %v596_v3 = vmul.f32 %v2296_v48, %v2296_v48  ;;  %3231 = vst [vmem:[#allocation25_spill] sm:$0xff] %v2320_v46  ;;  %v2326_v48 = vsub.f32 %v3232_v17, %v1993_v29  ;;  %v3238_v17 = vld [vmem:[#allocation29_spill] sm:$0xff] }
 0x1a2   : > { %v689_v54 = vadd.f32 %v688_v52, %v592_v56  ;;  %v597_v56 = vmul.f32 %v2302_v1, %v2302_v1  ;;  %3233 = vst [vmem:[#allocation26_spill] sm:$0xff] %v2326_v48  ;;  %v2332_v1 = vsub.f32 %v3234_v50, %v1993_v29  ;;  %v3240_v50 = vld [vmem:[#allocation30_spill] sm:$0xff] }
 0x1a4   : > { %v690_v63 = vadd.f32 %v689_v54, %v593_v58  ;;  %v598_v58 = vmul.f32 %v2308_v6, %v2308_v6  ;;  %3235 = vst [vmem:[#allocation27_spill] sm:$0xff] %v2332_v1  ;;  %v2338_v6 = vsub.f32 %v3236_v45, %v1993_v29  ;;  %v3242_v45 = vld [vmem:[#allocation31_spill] sm:$0xff] }
 0x1a6   : > { %v691_v31 = vadd.f32 %v690_v63, %v594_v60  ;;  %v599_v60 = vmul.f32 %v2314_v44, %v2314_v44  ;;  %3237 = vst [vmem:[#allocation28_spill] sm:$0xff] %v2338_v6  ;;  %v2344_v44 = vsub.f32 %v3238_v17, %v1993_v29  ;;  %v3244_v17 = vld [vmem:[#allocation32_spill] sm:$0xff] }
 0x1a8   : > { %v692_v52 = vadd.f32 %v691_v31, %v595_v62  ;;  %v600_v62 = vmul.f32 %v2320_v46, %v2320_v46  ;;  %3239 = vst [vmem:[#allocation29_spill] sm:$0xff] %v2344_v44  ;;  %v2350_v46 = vsub.f32 %v3240_v50, %v1993_v29  ;;  %v3246_v50 = vld [vmem:[#allocation33_spill] sm:$0xff] }
 0x1aa   : > { %v693_v54 = vadd.f32 %v692_v52, %v596_v3  ;;  %v601_v3 = vmul.f32 %v2326_v48, %v2326_v48  ;;  %3241 = vst [vmem:[#allocation30_spill] sm:$0xff] %v2350_v46  ;;  %v2356_v48 = vsub.f32 %v3242_v45, %v1993_v29  ;;  %v3248_v45 = vld [vmem:[#allocation34_spill] sm:$0xff] }
 0x1ac   : > { %v694_v63 = vadd.f32 %v693_v54, %v597_v56  ;;  %v602_v56 = vmul.f32 %v2332_v1, %v2332_v1  ;;  %3243 = vst [vmem:[#allocation31_spill] sm:$0xff] %v2356_v48  ;;  %v2362_v1 = vsub.f32 %v3244_v17, %v1993_v29  ;;  %v3250_v17 = vld [vmem:[#allocation35_spill] sm:$0xff] }
 0x1ae   : > { %v695_v31 = vadd.f32 %v694_v63, %v598_v58  ;;  %v603_v58 = vmul.f32 %v2338_v6, %v2338_v6  ;;  %3245 = vst [vmem:[#allocation32_spill] sm:$0xff] %v2362_v1  ;;  %v2368_v6 = vsub.f32 %v3246_v50, %v1993_v29  ;;  %v3252_v50 = vld [vmem:[#allocation36_spill] sm:$0xff] }
 0x1b0   : > { %v696_v52 = vadd.f32 %v695_v31, %v599_v60  ;;  %v604_v60 = vmul.f32 %v2344_v44, %v2344_v44  ;;  %3247 = vst [vmem:[#allocation33_spill] sm:$0xff] %v2368_v6  ;;  %v2374_v44 = vsub.f32 %v3248_v45, %v1993_v29  ;;  %v3254_v45 = vld [vmem:[#allocation37_spill] sm:$0xff] }
 0x1b2   : > { %v697_v54 = vadd.f32 %v696_v52, %v600_v62  ;;  %v605_v62 = vmul.f32 %v2350_v46, %v2350_v46  ;;  %3249 = vst [vmem:[#allocation34_spill] sm:$0xff] %v2374_v44  ;;  %v2380_v46 = vsub.f32 %v3250_v17, %v1993_v29  ;;  %v3256_v17 = vld [vmem:[#allocation38_spill] sm:$0xff] }
 0x1b4   : > { %v698_v63 = vadd.f32 %v697_v54, %v601_v3  ;;  %v606_v3 = vmul.f32 %v2356_v48, %v2356_v48  ;;  %3251 = vst [vmem:[#allocation35_spill] sm:$0xff] %v2380_v46  ;;  %v2386_v48 = vsub.f32 %v3252_v50, %v1993_v29  ;;  %v3258_v50 = vld [vmem:[#allocation39_spill] sm:$0xff] }
 0x1b6   : > { %v699_v31 = vadd.f32 %v698_v63, %v602_v56  ;;  %v607_v56 = vmul.f32 %v2362_v1, %v2362_v1  ;;  %3253 = vst [vmem:[#allocation36_spill] sm:$0xff] %v2386_v48  ;;  %v2392_v1 = vsub.f32 %v3254_v45, %v1993_v29  ;;  %v3260_v45 = vld [vmem:[#allocation40_spill] sm:$0xff] }
 0x1b8   : > { %v700_v52 = vadd.f32 %v699_v31, %v603_v58  ;;  %v608_v58 = vmul.f32 %v2368_v6, %v2368_v6  ;;  %3255 = vst [vmem:[#allocation37_spill] sm:$0xff] %v2392_v1  ;;  %v2398_v6 = vsub.f32 %v3256_v17, %v1993_v29  ;;  %v3262_v17 = vld [vmem:[#allocation41_spill] sm:$0xff] }
 0x1ba   : > { %v701_v54 = vadd.f32 %v700_v52, %v604_v60  ;;  %v609_v60 = vmul.f32 %v2374_v44, %v2374_v44  ;;  %3257 = vst [vmem:[#allocation38_spill] sm:$0xff] %v2398_v6  ;;  %v2404_v44 = vsub.f32 %v3258_v50, %v1993_v29  ;;  %v3264_v50 = vld [vmem:[#allocation42_spill] sm:$0xff] }
 0x1bc   : > { %v702_v63 = vadd.f32 %v701_v54, %v605_v62  ;;  %v610_v62 = vmul.f32 %v2380_v46, %v2380_v46  ;;  %3259 = vst [vmem:[#allocation39_spill] sm:$0xff] %v2404_v44  ;;  %v2410_v46 = vsub.f32 %v3260_v45, %v1993_v29  ;;  %v3266_v45 = vld [vmem:[#allocation43_spill] sm:$0xff] }
 0x1be   : > { %v703_v31 = vadd.f32 %v702_v63, %v606_v3  ;;  %v611_v3 = vmul.f32 %v2386_v48, %v2386_v48  ;;  %3261 = vst [vmem:[#allocation40_spill] sm:$0xff] %v2410_v46  ;;  %v2416_v48 = vsub.f32 %v3262_v17, %v1993_v29  ;;  %v3268_v17 = vld [vmem:[#allocation44_spill] sm:$0xff] }
 0x1c0   : > { %v704_v52 = vadd.f32 %v703_v31, %v607_v56  ;;  %v612_v56 = vmul.f32 %v2392_v1, %v2392_v1  ;;  %3263 = vst [vmem:[#allocation41_spill] sm:$0xff] %v2416_v48  ;;  %v2422_v1 = vsub.f32 %v3264_v50, %v1993_v29  ;;  %v3270_v50 = vld [vmem:[#allocation45_spill] sm:$0xff] }
 0x1c2   : > { %v705_v54 = vadd.f32 %v704_v52, %v608_v58  ;;  %v613_v58 = vmul.f32 %v2398_v6, %v2398_v6  ;;  %3265 = vst [vmem:[#allocation42_spill] sm:$0xff] %v2422_v1  ;;  %v2428_v6 = vsub.f32 %v3266_v45, %v1993_v29  ;;  %v3272_v45 = vld [vmem:[#allocation46_spill] sm:$0xff] }
 0x1c4   : > { %v706_v63 = vadd.f32 %v705_v54, %v609_v60  ;;  %v614_v60 = vmul.f32 %v2404_v44, %v2404_v44  ;;  %3267 = vst [vmem:[#allocation43_spill] sm:$0xff] %v2428_v6  ;;  %v2434_v44 = vsub.f32 %v3268_v17, %v1993_v29  ;;  %v3274_v17 = vld [vmem:[#allocation47_spill] sm:$0xff] }
 0x1c6   : > { %v707_v31 = vadd.f32 %v706_v63, %v610_v62  ;;  %v615_v62 = vmul.f32 %v2410_v46, %v2410_v46  ;;  %3269 = vst [vmem:[#allocation44_spill] sm:$0xff] %v2434_v44  ;;  %v2440_v46 = vsub.f32 %v3270_v50, %v1993_v29  ;;  %v3276_v50 = vld [vmem:[#allocation48_spill] sm:$0xff] }
 0x1c8   : > { %v708_v52 = vadd.f32 %v707_v31, %v611_v3  ;;  %v616_v3 = vmul.f32 %v2416_v48, %v2416_v48  ;;  %3271 = vst [vmem:[#allocation45_spill] sm:$0xff] %v2440_v46  ;;  %v2446_v48 = vsub.f32 %v3272_v45, %v1993_v29  ;;  %v3278_v45 = vld [vmem:[#allocation49_spill] sm:$0xff] }
 0x1ca   : > { %v709_v54 = vadd.f32 %v708_v52, %v612_v56  ;;  %v617_v56 = vmul.f32 %v2422_v1, %v2422_v1  ;;  %3273 = vst [vmem:[#allocation46_spill] sm:$0xff] %v2446_v48  ;;  %v2452_v1 = vsub.f32 %v3274_v17, %v1993_v29  ;;  %v3280_v17 = vld [vmem:[#allocation50_spill] sm:$0xff] }
 0x1cc   : > { %v710_v63 = vadd.f32 %v709_v54, %v613_v58  ;;  %v618_v58 = vmul.f32 %v2428_v6, %v2428_v6  ;;  %3275 = vst [vmem:[#allocation47_spill] sm:$0xff] %v2452_v1  ;;  %v2458_v6 = vsub.f32 %v3276_v50, %v1993_v29  ;;  %v3282_v50 = vld [vmem:[#allocation51_spill] sm:$0xff] }
 0x1ce   : > { %v711_v31 = vadd.f32 %v710_v63, %v614_v60  ;;  %v619_v60 = vmul.f32 %v2434_v44, %v2434_v44  ;;  %3277 = vst [vmem:[#allocation48_spill] sm:$0xff] %v2458_v6  ;;  %v2464_v44 = vsub.f32 %v3278_v45, %v1993_v29  ;;  %v3284_v45 = vld [vmem:[#allocation52_spill] sm:$0xff] }
 0x1d0   : > { %v712_v52 = vadd.f32 %v711_v31, %v615_v62  ;;  %v620_v62 = vmul.f32 %v2440_v46, %v2440_v46  ;;  %3279 = vst [vmem:[#allocation49_spill] sm:$0xff] %v2464_v44  ;;  %v2470_v46 = vsub.f32 %v3280_v17, %v1993_v29  ;;  %v3286_v17 = vld [vmem:[#allocation53_spill] sm:$0xff] }
 0x1d2   : > { %v713_v54 = vadd.f32 %v712_v52, %v616_v3  ;;  %v621_v3 = vmul.f32 %v2446_v48, %v2446_v48  ;;  %3281 = vst [vmem:[#allocation50_spill] sm:$0xff] %v2470_v46  ;;  %v2476_v48 = vsub.f32 %v3282_v50, %v1993_v29  ;;  %v3288_v50 = vld [vmem:[#allocation54_spill] sm:$0xff] }
 0x1d4   : > { %v714_v63 = vadd.f32 %v713_v54, %v617_v56  ;;  %v622_v56 = vmul.f32 %v2452_v1, %v2452_v1  ;;  %3283 = vst [vmem:[#allocation51_spill] sm:$0xff] %v2476_v48  ;;  %v2482_v1 = vsub.f32 %v3284_v45, %v1993_v29  ;;  %v3290_v45 = vld [vmem:[#allocation55_spill] sm:$0xff] }
 0x1d6   : > { %v715_v31 = vadd.f32 %v714_v63, %v618_v58  ;;  %v623_v58 = vmul.f32 %v2458_v6, %v2458_v6  ;;  %3285 = vst [vmem:[#allocation52_spill] sm:$0xff] %v2482_v1  ;;  %v2488_v6 = vsub.f32 %v3286_v17, %v1993_v29  ;;  %v3292_v17 = vld [vmem:[#allocation56_spill] sm:$0xff] }
 0x1d8   : > { %v716_v52 = vadd.f32 %v715_v31, %v619_v60  ;;  %v624_v60 = vmul.f32 %v2464_v44, %v2464_v44  ;;  %3287 = vst [vmem:[#allocation53_spill] sm:$0xff] %v2488_v6  ;;  %v2494_v44 = vsub.f32 %v3288_v50, %v1993_v29  ;;  %v3293_v50 = vld [vmem:[#allocation57_spill] sm:$0xff] }
 0x1da   : > { %v717_v54 = vadd.f32 %v716_v52, %v620_v62  ;;  %v625_v62 = vmul.f32 %v2470_v46, %v2470_v46  ;;  %3289 = vst [vmem:[#allocation54_spill] sm:$0xff] %v2494_v44  ;;  %v2500_v46 = vsub.f32 %v3290_v45, %v1993_v29  ;;  %v3295_v45 = vld [vmem:[#allocation58_spill] sm:$0xff] }
 0x1dc   : > { %v718_v63 = vadd.f32 %v717_v54, %v621_v3  ;;  %v626_v3 = vmul.f32 %v2476_v48, %v2476_v48  ;;  %3291 = vst [vmem:[#allocation55_spill] sm:$0xff] %v2500_v46  ;;  %v2506_v48 = vsub.f32 %v3292_v17, %v1993_v29  ;;  %v3296_v17 = vld [vmem:[#allocation59_spill] sm:$0xff] }
 0x1de   : > { %v719_v31 = vadd.f32 %v718_v63, %v622_v56  ;;  %v627_v56 = vmul.f32 %v2482_v1, %v2482_v1  ;;  %v2512_v1 = vsub.f32 %v3293_v50, %v1993_v29  ;;  %v3297_v50 = vld [vmem:[#allocation60_spill] sm:$0xff] }
 0x1e0   : > { %v720_v52 = vadd.f32 %v719_v31, %v623_v58  ;;  %v628_v58 = vmul.f32 %v2488_v6, %v2488_v6  ;;  %3294 = vst [vmem:[#allocation56_spill] sm:$0xff] %v2512_v1  ;;  %v2518_v6 = vsub.f32 %v3295_v45, %v1993_v29 }
 0x1e2   : > { %v721_v54 = vadd.f32 %v720_v52, %v624_v60  ;;  %v629_v60 = vmul.f32 %v2494_v44, %v2494_v44  ;;  %v2524_v44 = vsub.f32 %v3296_v17, %v1993_v29 }
 0x1e4   : > { %v722_v63 = vadd.f32 %v721_v54, %v625_v62  ;;  %v630_v62 = vmul.f32 %v2500_v46, %v2500_v46  ;;  %v2530_v46 = vsub.f32 %v3297_v50, %v1993_v29  ;;  %v634_v45 = vmul.f32 %v2524_v44, %v2524_v44 }
 0x1e5   : > { %v637_v29 = vmul.f32 %v1999_v51, %v1999_v51  ;;  %v638_v50 = vmul.f32 %v2002_v39, %v2002_v39 }
 0x1e6   : > { %v723_v31 = vadd.f32 %v722_v63, %v626_v3  ;;  %v631_v3 = vmul.f32 %v2506_v48, %v2506_v48 }
 0x1e8   : > { %v724_v52 = vadd.f32 %v723_v31, %v627_v56  ;;  %v632_v56 = vmul.f32 %v2512_v1, %v2512_v1  ;;  %v636_v1 = vmul.f32 %v1996_v55, %v1996_v55 }
 0x1ea   : > { %v725_v54 = vadd.f32 %v724_v52, %v628_v58  ;;  %v633_v58 = vmul.f32 %v2518_v6, %v2518_v6 }
 0x1ec   : > { %v726_v63 = vadd.f32 %v725_v54, %v629_v60  ;;  %v635_v54 = vmul.f32 %v2530_v46, %v2530_v46 }
 0x1ee   : > { %v727_v31 = vadd.f32 %v726_v63, %v630_v62 }
 0x1f0   : > { %v728_v52 = vadd.f32 %v727_v31, %v631_v3  ;;  %v639_v31 = vmul.f32 %v2005_v49, %v2005_v49 }
 0x1f2   : > { %v729_v60 = vadd.f32 %v728_v52, %v632_v56  ;;  %v640_v52 = vmul.f32 %v2008_v19, %v2008_v19 }
 0x1f4   : > { %v730_v17 = vadd.f32 %v729_v60, %v633_v58  ;;  %v641_v60 = vmul.f32 %v2011_v15, %v2011_v15 }
 0x1f6   : > { %v731_v62 = vadd.f32 %v730_v17, %v634_v45  ;;  %v642_v17 = vmul.f32 %v2014_v7, %v2014_v7 }
 0x1f8   : > { %v732_v63 = vadd.f32 %v731_v62, %v635_v54  ;;  %v643_v62 = vmul.f32 %v2017_v11, %v2017_v11 }
 0x1fa   : > { %v733_v3 = vadd.f32 %v732_v63, %v636_v1  ;;  %v644_v63 = vmul.f32 %v2020_v23, %v2020_v23 }
 0x1fc   : > { %v734_v56 = vadd.f32 %v733_v3, %v637_v29  ;;  %v645_v3 = vmul.f32 %v2023_v27, %v2023_v27 }
 0x1fe   : > { %v735_v58 = vadd.f32 %v734_v56, %v638_v50  ;;  %v646_v56 = vmul.f32 %v2026_v25, %v2026_v25 }
 0x200   : > { %v736_v45 = vadd.f32 %v735_v58, %v639_v31  ;;  %v647_v58 = vmul.f32 %v2029_v9, %v2029_v9 }
 0x202   : > { %v737_v54 = vadd.f32 %v736_v45, %v640_v52  ;;  %v648_v45 = vmul.f32 %v2032_v41, %v2032_v41 }
 0x204   : > { %v738_v1 = vadd.f32 %v737_v54, %v641_v60  ;;  %v649_v54 = vmul.f32 %v2035_v57, %v2035_v57 }
 0x206   : > { %v739_v29 = vadd.f32 %v738_v1, %v642_v17 }
 0x208   : > { %v740_v50 = vadd.f32 %v739_v29, %v643_v62  ;;  %v650_v62 = vmul.f32 %v2038_v59, %v2038_v59 }
 0x20a   : > { %v741_v31 = vadd.f32 %v740_v50, %v644_v63 }
 0x20c   : > { %v742_v52 = vadd.f32 %v741_v31, %v645_v3 }
 0x20e   : > { %v743_v60 = vadd.f32 %v742_v52, %v646_v56  ;;  %v759_v52 = vlaneseq }
 0x210   : > { %v744_v17 = vadd.f32 %v743_v60, %v647_v58  ;;  %v760_v57 = vshrl.u32 %v759_v52, 7  ;;  %v757_v58 = vld [vmem:[%s214_s9] sm:$0x1] }
 0x212   : > { %v745_v1 = vadd.f32 %v744_v17, %v648_v45  ;;  %v761_v60 = vsub.s32 0, %v760_v57 }
 0x214   : > { %v746_v29 = vadd.f32 %v745_v1, %v649_v54  ;;  %v2573_v54 = vld [vmem:[%s222_s22] ss:$0 sm:$0xff] }
 0x216   : > { %v747_v25 = vadd.f32 %v746_v29, %v650_v62 }
 0x218   : > { %v748_v63 = vrot.slane %v747_v25, 4 }
 0x21a   : > { %v749_v50 = vadd.f32 %v748_v63, %v747_v25 }
 0x21c   : > { %v750_v9 = vrot.slane %v749_v50, 2 }
 0x21e   : > { %v751_v3 = vadd.f32 %v750_v9, %v749_v50 }
 0x220   : > { %v752_v31 = vrot.slane %v751_v3, 1 }
 0x222   : > { %v753_v27 = vadd.f32 %v752_v31, %v751_v3 }
 0x224   : > { %v754_v41 = vmul.f32 0.0012755102, %v753_v27 }
 0x226   : > { %v755_v56 = vadd.f32 1e-05, %v754_v41 }
 0x228   : > { %1262 = vrsqrt.f32 %v755_v56 }
 0x232   : > { %v1263_v23 = vpop.eup %1262 }
 0x233   : > { %v758_v59 = vmul.f32 %v1263_v23, %v757_v58 }
 0x235   : > { %v2570_v45 = vrot.slane %v758_v59, %v761_v60 }
 0x237   : > { %v763_v25 = vmul.f32 %v2570_v45, %v2042_v5  ;;  %v764_v27 = vmul.f32 %v2570_v45, %v2046_v47  ;;  %v765_v9 = vmul.f32 %v2570_v45, %v2050_v43  ;;  %v766_v41 = vmul.f32 %v2570_v45, %v2054_v35 }
 0x238   : > { %v767_v23 = vmul.f32 %v2570_v45, %v2062_v0  ;;  %v768_v57 = vmul.f32 %v2570_v45, %v2068_v2  ;;  %v769_v59 = vmul.f32 %v2570_v45, %v2074_v13  ;;  %v770_v5 = vmul.f32 %v2570_v45, %v2080_v53 }
 0x239   : > { %v868_v47 = vadd.f32 %v2573_v54, %v763_v25  ;;  %v869_v17 = vadd.f32 %v2573_v54, %v764_v27  ;;  %v870_v43 = vadd.f32 %v2573_v54, %v765_v9  ;;  %v871_v35 = vadd.f32 %v2573_v54, %v766_v41 }
 0x23a   : > { %v872_v62 = vadd.f32 %v2573_v54, %v767_v23  ;;  %v873_v0 = vadd.f32 %v2573_v54, %v768_v57  ;;  %v874_v2 = vadd.f32 %v2573_v54, %v769_v59  ;;  %v875_v1 = vadd.f32 %v2573_v54, %v770_v5 }
 0x23b   : > { %966 = vst [vmem:[%s2601_s28] sm:$0xff] %v868_v47  ;;  %967 = vst [vmem:[%s2601_s28 + $0x8] sm:$0xff] %v869_v17  ;;  %v771_v13 = vmul.f32 %v2570_v45, %v2086_v61  ;;  %v772_v53 = vmul.f32 %v2570_v45, %v2092_v21  ;;  %v773_v29 = vmul.f32 %v2570_v45, %v2098_v37  ;;  %v3298_v17 = vld [vmem:[#allocation68_spill] sm:$0xff] }
 0x23c   : > { %968 = vst [vmem:[%s2601_s28 + $0x10] sm:$0xff] %v870_v43  ;;  %969 = vst [vmem:[%s2601_s28 + $0x18] sm:$0xff] %v871_v35  ;;  %v774_v63 = vmul.f32 %v2570_v45, %v2104_v4  ;;  %v775_v61 = vmul.f32 %v2570_v45, %v2110_v33  ;;  %v776_v21 = vmul.f32 %v2570_v45, %v2116_v8 }
 0x23d   : > { %970 = vst [vmem:[%s2601_s28 + $0x20] sm:$0xff] %v872_v62  ;;  %971 = vst [vmem:[%s2601_s28 + $0x28] sm:$0xff] %v873_v0  ;;  %v777_v37 = vmul.f32 %v2570_v45, %v2122_v10  ;;  %v778_v4 = vmul.f32 %v2570_v45, %v2128_v12  ;;  %v876_v50 = vadd.f32 %v2573_v54, %v771_v13 }
 0x23e   : > { %972 = vst [vmem:[%s2601_s28 + $0x30] sm:$0xff] %v874_v2  ;;  %973 = vst [vmem:[%s2601_s28 + $0x38] sm:$0xff] %v875_v1  ;;  %v877_v3 = vadd.f32 %v2573_v54, %v772_v53  ;;  %v878_v31 = vadd.f32 %v2573_v54, %v773_v29  ;;  %v879_v33 = vadd.f32 %v2573_v54, %v774_v63  ;;  %v3299_v1 = vld [vmem:[#allocation69_spill] sm:$0xff]  ;;  %v3300_v53 = vld [vmem:[#allocation70_spill] sm:$0xff] }
 0x23f   : > { %v880_v8 = vadd.f32 %v2573_v54, %v775_v61  ;;  %v881_v56 = vadd.f32 %v2573_v54, %v776_v21  ;;  %v882_v10 = vadd.f32 %v2573_v54, %v777_v37  ;;  %v883_v12 = vadd.f32 %v2573_v54, %v778_v4  ;;  %974 = vst [vmem:[%s2601_s28 + $0x40] sm:$0xff] %v876_v50  ;;  %v3301_v63 = vld [vmem:[#allocation12_spill] sm:$0xff]  ;;  %v3302_v21 = vld [vmem:[#allocation13_spill] sm:$0xff]  ;;  %v3303_v4 = vld [vmem:[#allocation14_spill] sm:$0xff] }
 0x240   : > { %975 = vst [vmem:[%s2601_s28 + $0x48] sm:$0xff] %v877_v3  ;;  %976 = vst [vmem:[%s2601_s28 + $0x50] sm:$0xff] %v878_v31  ;;  %v779_v52 = vmul.f32 %v2570_v45, %v2134_v14  ;;  %v780_v58 = vmul.f32 %v2570_v45, %v2140_v16  ;;  %v781_v60 = vmul.f32 %v2570_v45, %v2146_v18  ;;  %v3304_v3 = vld [vmem:[#allocation15_spill] sm:$0xff] }
 0x241   : > { %977 = vst [vmem:[%s2601_s28 + $0x58] sm:$0xff] %v879_v33  ;;  %v782_v25 = vmul.f32 %v2570_v45, %v2152_v20  ;;  %978 = vst [vmem:[%s2601_s28 + $0x60] sm:$0xff] %v880_v8  ;;  %v783_v14 = vmul.f32 %v2570_v45, %v2158_v22  ;;  %v784_v16 = vmul.f32 %v2570_v45, %v2164_v24  ;;  %v3305_v33 = vld [vmem:[#allocation16_spill] sm:$0xff] }
 0x242   : > { %979 = vst [vmem:[%s2601_s28 + $0x68] sm:$0xff] %v881_v56  ;;  %980 = vst [vmem:[%s2601_s28 + $0x70] sm:$0xff] %v882_v10  ;;  %v785_v18 = vmul.f32 %v2570_v45, %v2170_v26  ;;  %v786_v20 = vmul.f32 %v2570_v45, %v2176_v28  ;;  %v884_v27 = vadd.f32 %v2573_v54, %v779_v52  ;;  %v3306_v56 = vld [vmem:[#allocation17_spill] sm:$0xff] }
 0x243   : > { %981 = vst [vmem:[%s2601_s28 + $0x78] sm:$0xff] %v883_v12  ;;  %v885_v9 = vadd.f32 %v2573_v54, %v780_v58  ;;  %v886_v41 = vadd.f32 %v2573_v54, %v781_v60  ;;  %v887_v22 = vadd.f32 %v2573_v54, %v782_v25  ;;  %v888_v24 = vadd.f32 %v2573_v54, %v783_v14 }
 0x244   : > { %v889_v23 = vadd.f32 %v2573_v54, %v784_v16  ;;  %v890_v26 = vadd.f32 %v2573_v54, %v785_v18  ;;  %v891_v28 = vadd.f32 %v2573_v54, %v786_v20  ;;  %982 = vst [vmem:[%s2601_s28 + $0x80] sm:$0xff] %v884_v27  ;;  %v787_v57 = vmul.f32 %v2570_v45, %v2182_v30  ;;  %v3307_v20 = vld [vmem:[#allocation18_spill] sm:$0xff] }
 0x245   : > { %983 = vst [vmem:[%s2601_s28 + $0x88] sm:$0xff] %v885_v9  ;;  %984 = vst [vmem:[%s2601_s28 + $0x90] sm:$0xff] %v886_v41  ;;  %v788_v59 = vmul.f32 %v2570_v45, %v2188_v32  ;;  %v789_v5 = vmul.f32 %v2570_v45, %v2194_v34  ;;  %v790_v47 = vmul.f32 %v2570_v45, %v2200_v36  ;;  %v3308_v9 = vld [vmem:[#allocation19_spill] sm:$0xff] }
 0x246   : > { %985 = vst [vmem:[%s2601_s28 + $0x98] sm:$0xff] %v887_v22  ;;  %986 = vst [vmem:[%s2601_s28 + $0xa0] sm:$0xff] %v888_v24  ;;  %v791_v30 = vmul.f32 %v2570_v45, %v2206_v38  ;;  %v792_v32 = vmul.f32 %v2570_v45, %v2212_v40  ;;  %v793_v34 = vmul.f32 %v2570_v45, %v2218_v42  ;;  %v3309_v22 = vld [vmem:[#allocation20_spill] sm:$0xff] }
 0x247   : > { %987 = vst [vmem:[%s2601_s28 + $0xa8] sm:$0xff] %v889_v23  ;;  %988 = vst [vmem:[%s2601_s28 + $0xb0] sm:$0xff] %v890_v26  ;;  %v794_v36 = vmul.f32 %v2570_v45, %v3298_v17  ;;  %v892_v43 = vadd.f32 %v2573_v54, %v787_v57  ;;  %v893_v35 = vadd.f32 %v2573_v54, %v788_v59  ;;  %v3310_v23 = vld [vmem:[#allocation21_spill] sm:$0xff]  ;;  %v3312_v59 = vld [vmem:[#allocation23_spill] sm:$0xff] }
 0x248   : > { %989 = vst [vmem:[%s2601_s28 + $0xb8] sm:$0xff] %v891_v28  ;;  %v894_v62 = vadd.f32 %v2573_v54, %v789_v5  ;;  %v895_v38 = vadd.f32 %v2573_v54, %v790_v47  ;;  %v896_v40 = vadd.f32 %v2573_v54, %v791_v30  ;;  %v897_v0 = vadd.f32 %v2573_v54, %v792_v32  ;;  %v3311_v28 = vld [vmem:[#allocation22_spill] sm:$0xff]  ;;  %v3313_v47 = vld [vmem:[#allocation24_spill] sm:$0xff]  ;;  %v3314_v32 = vld [vmem:[#allocation25_spill] sm:$0xff] }
 0x249   : > { %v898_v42 = vadd.f32 %v2573_v54, %v793_v34  ;;  %v899_v2 = vadd.f32 %v2573_v54, %v794_v36  ;;  %990 = vst [vmem:[%s2601_s28 + $0xc0] sm:$0xff] %v892_v43  ;;  %991 = vst [vmem:[%s2601_s28 + $0xc8] sm:$0xff] %v893_v35  ;;  %v795_v13 = vmul.f32 %v2570_v45, %v3299_v1  ;;  %v3316_v1 = vld [vmem:[#allocation27_spill] sm:$0xff] }
 0x24a   : > { %992 = vst [vmem:[%s2601_s28 + $0xd0] sm:$0xff] %v894_v62  ;;  %993 = vst [vmem:[%s2601_s28 + $0xd8] sm:$0xff] %v895_v38  ;;  %v796_v29 = vmul.f32 %v2570_v45, %v3300_v53  ;;  %v797_v61 = vmul.f32 %v2570_v45, %v3301_v63  ;;  %v798_v37 = vmul.f32 %v2570_v45, %v3302_v21  ;;  %v3317_v53 = vld [vmem:[#allocation28_spill] sm:$0xff]  ;;  %v3318_v63 = vld [vmem:[#allocation29_spill] sm:$0xff] }
 0x24b   : > { %994 = vst [vmem:[%s2601_s28 + $0xe0] sm:$0xff] %v896_v40  ;;  %995 = vst [vmem:[%s2601_s28 + $0xe8] sm:$0xff] %v897_v0  ;;  %v799_v50 = vmul.f32 %v2570_v45, %v3303_v4  ;;  %v800_v31 = vmul.f32 %v2570_v45, %v3304_v3  ;;  %v801_v8 = vmul.f32 %v2570_v45, %v3305_v33  ;;  %v3319_v21 = vld [vmem:[#allocation30_spill] sm:$0xff]  ;;  %v3320_v4 = vld [vmem:[#allocation31_spill] sm:$0xff] }
 0x24c   : > { %996 = vst [vmem:[%s2601_s28 + $0xf0] sm:$0xff] %v898_v42  ;;  %997 = vst [vmem:[%s2601_s28 + $0xf8] sm:$0xff] %v899_v2  ;;  %v802_v10 = vmul.f32 %v2570_v45, %v3306_v56  ;;  %v900_v12 = vadd.f32 %v2573_v54, %v795_v13  ;;  %v901_v52 = vadd.f32 %v2573_v54, %v796_v29  ;;  %v3315_v42 = vld [vmem:[#allocation26_spill] sm:$0xff]  ;;  %v3321_v3 = vld [vmem:[#allocation32_spill] sm:$0xff] }
 0x24d   : > { %v902_v58 = vadd.f32 %v2573_v54, %v797_v61  ;;  %v903_v60 = vadd.f32 %v2573_v54, %v798_v37  ;;  %v904_v25 = vadd.f32 %v2573_v54, %v799_v50  ;;  %v905_v14 = vadd.f32 %v2573_v54, %v800_v31  ;;  %v3322_v33 = vld [vmem:[#allocation33_spill] sm:$0xff] }
 0x24e   : > { %v906_v16 = vadd.f32 %v2573_v54, %v801_v8  ;;  %v907_v18 = vadd.f32 %v2573_v54, %v802_v10  ;;  %998 = vst [vmem:[%s2601_s28 + $0x100] sm:$0xff] %v900_v12  ;;  %999 = vst [vmem:[%s2601_s28 + $0x108] sm:$0xff] %v901_v52  ;;  %v803_v27 = vmul.f32 %v2570_v45, %v3307_v20  ;;  %v3324_v20 = vld [vmem:[#allocation35_spill] sm:$0xff] }
 0x24f   : > { %1000 = vst [vmem:[%s2601_s28 + $0x110] sm:$0xff] %v902_v58  ;;  %1001 = vst [vmem:[%s2601_s28 + $0x118] sm:$0xff] %v903_v60  ;;  %v804_v41 = vmul.f32 %v2570_v45, %v3308_v9  ;;  %v805_v24 = vmul.f32 %v2570_v45, %v3309_v22  ;;  %v806_v26 = vmul.f32 %v2570_v45, %v3310_v23  ;;  %v3325_v9 = vld [vmem:[#allocation36_spill] sm:$0xff]  ;;  %v3326_v22 = vld [vmem:[#allocation37_spill] sm:$0xff] }
 0x250   : > { %1002 = vst [vmem:[%s2601_s28 + $0x120] sm:$0xff] %v904_v25  ;;  %1003 = vst [vmem:[%s2601_s28 + $0x128] sm:$0xff] %v905_v14  ;;  %v807_v57 = vmul.f32 %v2570_v45, %v3311_v28  ;;  %v808_v5 = vmul.f32 %v2570_v45, %v3312_v59  ;;  %v809_v30 = vmul.f32 %v2570_v45, %v3313_v47  ;;  %v3327_v23 = vld [vmem:[#allocation38_spill] sm:$0xff]  ;;  %v3328_v28 = vld [vmem:[#allocation39_spill] sm:$0xff] }
 0x251   : > { %1004 = vst [vmem:[%s2601_s28 + $0x130] sm:$0xff] %v906_v16  ;;  %1005 = vst [vmem:[%s2601_s28 + $0x138] sm:$0xff] %v907_v18  ;;  %v810_v34 = vmul.f32 %v2570_v45, %v3314_v32  ;;  %v908_v17 = vadd.f32 %v2573_v54, %v803_v27  ;;  %v909_v36 = vadd.f32 %v2573_v54, %v804_v41  ;;  %v3323_v16 = vld [vmem:[#allocation34_spill] sm:$0xff]  ;;  %v3329_v59 = vld [vmem:[#allocation40_spill] sm:$0xff] }
 0x252   : > { %v910_v43 = vadd.f32 %v2573_v54, %v805_v24  ;;  %v911_v35 = vadd.f32 %v2573_v54, %v806_v26  ;;  %v912_v62 = vadd.f32 %v2573_v54, %v807_v57  ;;  %v913_v38 = vadd.f32 %v2573_v54, %v808_v5  ;;  %v3330_v47 = vld [vmem:[#allocation41_spill] sm:$0xff] }
 0x253   : > { %v914_v40 = vadd.f32 %v2573_v54, %v809_v30  ;;  %v915_v0 = vadd.f32 %v2573_v54, %v810_v34  ;;  %1006 = vst [vmem:[%s2601_s28 + $0x140] sm:$0xff] %v908_v17  ;;  %1007 = vst [vmem:[%s2601_s28 + $0x148] sm:$0xff] %v909_v36  ;;  %v811_v2 = vmul.f32 %v2570_v45, %v3315_v42  ;;  %v3332_v42 = vld [vmem:[#allocation43_spill] sm:$0xff] }
 0x254   : > { %1008 = vst [vmem:[%s2601_s28 + $0x150] sm:$0xff] %v910_v43  ;;  %1009 = vst [vmem:[%s2601_s28 + $0x158] sm:$0xff] %v911_v35  ;;  %v812_v13 = vmul.f32 %v2570_v45, %v3316_v1  ;;  %v813_v29 = vmul.f32 %v2570_v45, %v3317_v53  ;;  %v814_v61 = vmul.f32 %v2570_v45, %v3318_v63  ;;  %v3333_v1 = vld [vmem:[#allocation44_spill] sm:$0xff]  ;;  %v3334_v53 = vld [vmem:[#allocation45_spill] sm:$0xff] }
 0x255   : > { %1010 = vst [vmem:[%s2601_s28 + $0x160] sm:$0xff] %v912_v62  ;;  %1011 = vst [vmem:[%s2601_s28 + $0x168] sm:$0xff] %v913_v38  ;;  %v815_v37 = vmul.f32 %v2570_v45, %v3319_v21  ;;  %v816_v50 = vmul.f32 %v2570_v45, %v3320_v4  ;;  %v817_v31 = vmul.f32 %v2570_v45, %v3321_v3  ;;  %v3335_v63 = vld [vmem:[#allocation46_spill] sm:$0xff]  ;;  %v3336_v21 = vld [vmem:[#allocation47_spill] sm:$0xff] }
 0x256   : > { %1012 = vst [vmem:[%s2601_s28 + $0x170] sm:$0xff] %v914_v40  ;;  %1013 = vst [vmem:[%s2601_s28 + $0x178] sm:$0xff] %v915_v0  ;;  %v818_v8 = vmul.f32 %v2570_v45, %v3322_v33  ;;  %v916_v56 = vadd.f32 %v2573_v54, %v811_v2  ;;  %v917_v10 = vadd.f32 %v2573_v54, %v812_v13  ;;  %v3331_v40 = vld [vmem:[#allocation42_spill] sm:$0xff]  ;;  %v3337_v4 = vld [vmem:[#allocation48_spill] sm:$0xff] }
 0x257   : > { %v918_v12 = vadd.f32 %v2573_v54, %v813_v29  ;;  %v919_v52 = vadd.f32 %v2573_v54, %v814_v61  ;;  %v920_v58 = vadd.f32 %v2573_v54, %v815_v37  ;;  %v921_v60 = vadd.f32 %v2573_v54, %v816_v50  ;;  %v3338_v3 = vld [vmem:[#allocation49_spill] sm:$0xff] }
 0x258   : > { %v922_v25 = vadd.f32 %v2573_v54, %v817_v31  ;;  %v923_v14 = vadd.f32 %v2573_v54, %v818_v8  ;;  %1014 = vst [vmem:[%s2601_s28 + $0x180] sm:$0xff] %v916_v56  ;;  %1015 = vst [vmem:[%s2601_s28 + $0x188] sm:$0xff] %v917_v10  ;;  %v819_v18 = vmul.f32 %v2570_v45, %v3323_v16  ;;  %v3340_v16 = vld [vmem:[#allocation51_spill] sm:$0xff] }
 0x259   : > { %1016 = vst [vmem:[%s2601_s28 + $0x190] sm:$0xff] %v918_v12  ;;  %1017 = vst [vmem:[%s2601_s28 + $0x198] sm:$0xff] %v919_v52  ;;  %v820_v27 = vmul.f32 %v2570_v45, %v3324_v20  ;;  %v821_v41 = vmul.f32 %v2570_v45, %v3325_v9  ;;  %v822_v24 = vmul.f32 %v2570_v45, %v3326_v22  ;;  %v3341_v20 = vld [vmem:[#allocation52_spill] sm:$0xff]  ;;  %v3342_v9 = vld [vmem:[#allocation53_spill] sm:$0xff] }
 0x25a   : > { %1018 = vst [vmem:[%s2601_s28 + $0x1a0] sm:$0xff] %v920_v58  ;;  %1019 = vst [vmem:[%s2601_s28 + $0x1a8] sm:$0xff] %v921_v60  ;;  %v823_v26 = vmul.f32 %v2570_v45, %v3327_v23  ;;  %v824_v57 = vmul.f32 %v2570_v45, %v3328_v28  ;;  %v825_v5 = vmul.f32 %v2570_v45, %v3329_v59  ;;  %v3343_v22 = vld [vmem:[#allocation54_spill] sm:$0xff]  ;;  %v3344_v23 = vld [vmem:[#allocation55_spill] sm:$0xff] }
 0x25b   : > { %1020 = vst [vmem:[%s2601_s28 + $0x1b0] sm:$0xff] %v922_v25  ;;  %1021 = vst [vmem:[%s2601_s28 + $0x1b8] sm:$0xff] %v923_v14  ;;  %v826_v30 = vmul.f32 %v2570_v45, %v3330_v47  ;;  %v924_v32 = vadd.f32 %v2573_v54, %v819_v18  ;;  %v925_v34 = vadd.f32 %v2573_v54, %v820_v27  ;;  %v3339_v25 = vld [vmem:[#allocation50_spill] sm:$0xff] }
 0x25c   : > { %v926_v17 = vadd.f32 %v2573_v54, %v821_v41  ;;  %v927_v36 = vadd.f32 %v2573_v54, %v822_v24  ;;  %v928_v43 = vadd.f32 %v2573_v54, %v823_v26  ;;  %v929_v35 = vadd.f32 %v2573_v54, %v824_v57  ;;  %v3345_v57 = vld [vmem:[#allocation56_spill] sm:$0xff] }
 0x25d   : > { %v930_v62 = vadd.f32 %v2573_v54, %v825_v5  ;;  %v931_v38 = vadd.f32 %v2573_v54, %v826_v30  ;;  %1022 = vst [vmem:[%s2601_s28 + $0x1c0] sm:$0xff] %v924_v32  ;;  %1023 = vst [vmem:[%s2601_s28 + $0x1c8] sm:$0xff] %v925_v34  ;;  %v827_v0 = vmul.f32 %v2570_v45, %v3331_v40 }
 0x25e   : > { %1024 = vst [vmem:[%s2601_s28 + $0x1d0] sm:$0xff] %v926_v17  ;;  %1025 = vst [vmem:[%s2601_s28 + $0x1d8] sm:$0xff] %v927_v36  ;;  %v828_v2 = vmul.f32 %v2570_v45, %v3332_v42  ;;  %v829_v13 = vmul.f32 %v2570_v45, %v3333_v1  ;;  %v830_v29 = vmul.f32 %v2570_v45, %v3334_v53 }
 0x25f   : > { %1026 = vst [vmem:[%s2601_s28 + $0x1e0] sm:$0xff] %v928_v43  ;;  %1027 = vst [vmem:[%s2601_s28 + $0x1e8] sm:$0xff] %v929_v35  ;;  %v831_v61 = vmul.f32 %v2570_v45, %v3335_v63  ;;  %v832_v37 = vmul.f32 %v2570_v45, %v3336_v21  ;;  %v833_v50 = vmul.f32 %v2570_v45, %v3337_v4  ;;  %v3350_v4 = vld [vmem:[#allocation65_spill] sm:$0xff] }
 0x260   : > { %1028 = vst [vmem:[%s2601_s28 + $0x1f0] sm:$0xff] %v930_v62  ;;  %1029 = vst [vmem:[%s2601_s28 + $0x1f8] sm:$0xff] %v931_v38  ;;  %v834_v31 = vmul.f32 %v2570_v45, %v3338_v3  ;;  %v932_v33 = vadd.f32 %v2573_v54, %v827_v0  ;;  %v933_v8 = vadd.f32 %v2573_v54, %v828_v2 }
 0x261   : > { %v934_v56 = vadd.f32 %v2573_v54, %v829_v13  ;;  %v935_v10 = vadd.f32 %v2573_v54, %v830_v29  ;;  %v936_v12 = vadd.f32 %v2573_v54, %v831_v61  ;;  %v937_v52 = vadd.f32 %v2573_v54, %v832_v37  ;;  %v3346_v29 = vld [vmem:[#allocation61_spill] sm:$0xff]  ;;  %v3347_v61 = vld [vmem:[#allocation62_spill] sm:$0xff]  ;;  %v3349_v37 = vld [vmem:[#allocation64_spill] sm:$0xff] }
 0x262   : > { %v938_v58 = vadd.f32 %v2573_v54, %v833_v50  ;;  %v939_v60 = vadd.f32 %v2573_v54, %v834_v31  ;;  %1030 = vst [vmem:[%s2601_s28 + $0x200] sm:$0xff] %v932_v33  ;;  %1031 = vst [vmem:[%s2601_s28 + $0x208] sm:$0xff] %v933_v8  ;;  %v835_v14 = vmul.f32 %v2570_v45, %v3339_v25  ;;  %v3352_v25 = vld [vmem:[#allocation67_spill] sm:$0xff] }
 0x263   : > { %1032 = vst [vmem:[%s2601_s28 + $0x210] sm:$0xff] %v934_v56  ;;  %1033 = vst [vmem:[%s2601_s28 + $0x218] sm:$0xff] %v935_v10  ;;  %v836_v18 = vmul.f32 %v2570_v45, %v3340_v16  ;;  %v837_v27 = vmul.f32 %v2570_v45, %v3341_v20  ;;  %v838_v41 = vmul.f32 %v2570_v45, %v3342_v9 }
 0x264   : > { %1034 = vst [vmem:[%s2601_s28 + $0x220] sm:$0xff] %v936_v12  ;;  %1035 = vst [vmem:[%s2601_s28 + $0x228] sm:$0xff] %v937_v52  ;;  %v839_v24 = vmul.f32 %v2570_v45, %v3343_v22  ;;  %v840_v26 = vmul.f32 %v2570_v45, %v3344_v23  ;;  %v841_v28 = vmul.f32 %v2570_v45, %v2506_v48 }
 0x265   : > { %1036 = vst [vmem:[%s2601_s28 + $0x230] sm:$0xff] %v938_v58  ;;  %1037 = vst [vmem:[%s2601_s28 + $0x238] sm:$0xff] %v939_v60  ;;  %v842_v59 = vmul.f32 %v2570_v45, %v3345_v57  ;;  %v940_v5 = vadd.f32 %v2573_v54, %v835_v14  ;;  %v941_v47 = vadd.f32 %v2573_v54, %v836_v18  ;;  %v3351_v58 = vld [vmem:[#allocation66_spill] sm:$0xff] }
 0x266   : > { %v942_v30 = vadd.f32 %v2573_v54, %v837_v27  ;;  %v943_v32 = vadd.f32 %v2573_v54, %v838_v41  ;;  %v944_v34 = vadd.f32 %v2573_v54, %v839_v24  ;;  %v945_v17 = vadd.f32 %v2573_v54, %v840_v26 }
 0x267   : > { %v946_v48 = vadd.f32 %v2573_v54, %v841_v28  ;;  %v947_v36 = vadd.f32 %v2573_v54, %v842_v59  ;;  %1038 = vst [vmem:[%s2601_s28 + $0x240] sm:$0xff] %v940_v5  ;;  %1039 = vst [vmem:[%s2601_s28 + $0x248] sm:$0xff] %v941_v47  ;;  %v843_v43 = vmul.f32 %v2570_v45, %v2518_v6 }
 0x268   : > { %1040 = vst [vmem:[%s2601_s28 + $0x250] sm:$0xff] %v942_v30  ;;  %1041 = vst [vmem:[%s2601_s28 + $0x258] sm:$0xff] %v943_v32  ;;  %v844_v35 = vmul.f32 %v2570_v45, %v2524_v44  ;;  %v845_v62 = vmul.f32 %v2570_v45, %v2530_v46  ;;  %v846_v38 = vmul.f32 %v2570_v45, %v1996_v55 }
 0x269   : > { %1042 = vst [vmem:[%s2601_s28 + $0x260] sm:$0xff] %v944_v34  ;;  %1043 = vst [vmem:[%s2601_s28 + $0x268] sm:$0xff] %v945_v17  ;;  %v847_v6 = vmul.f32 %v2570_v45, %v1999_v51  ;;  %v848_v44 = vmul.f32 %v2570_v45, %v2002_v39  ;;  %v849_v46 = vmul.f32 %v2570_v45, %v2005_v49 }
 0x26a   : > { %1044 = vst [vmem:[%s2601_s28 + $0x270] sm:$0xff] %v946_v48  ;;  %1045 = vst [vmem:[%s2601_s28 + $0x278] sm:$0xff] %v947_v36  ;;  %v850_v55 = vmul.f32 %v2570_v45, %v2008_v19  ;;  %v948_v40 = vadd.f32 %v2573_v54, %v843_v43  ;;  %v949_v0 = vadd.f32 %v2573_v54, %v844_v35 }
 0x26b   : > { %v950_v42 = vadd.f32 %v2573_v54, %v845_v62  ;;  %v951_v51 = vadd.f32 %v2573_v54, %v846_v38  ;;  %v952_v39 = vadd.f32 %v2573_v54, %v847_v6  ;;  %v953_v2 = vadd.f32 %v2573_v54, %v848_v44 }
 0x26c   : > { %v954_v49 = vadd.f32 %v2573_v54, %v849_v46  ;;  %v955_v19 = vadd.f32 %v2573_v54, %v850_v55  ;;  %1046 = vst [vmem:[%s2601_s28 + $0x280] sm:$0xff] %v948_v40  ;;  %1047 = vst [vmem:[%s2601_s28 + $0x288] sm:$0xff] %v949_v0  ;;  %v851_v1 = vmul.f32 %v2570_v45, %v2011_v15  ;;  %v3348_v15 = vld [vmem:[#allocation63_spill] sm:$0xff] }
 0x26d   : > { %1048 = vst [vmem:[%s2601_s28 + $0x290] sm:$0xff] %v950_v42  ;;  %1049 = vst [vmem:[%s2601_s28 + $0x298] sm:$0xff] %v951_v51  ;;  %v852_v13 = vmul.f32 %v2570_v45, %v2014_v7  ;;  %v853_v53 = vmul.f32 %v2570_v45, %v2017_v11  ;;  %v854_v63 = vmul.f32 %v2570_v45, %v3346_v29 }
 0x26e   : > { %1050 = vst [vmem:[%s2601_s28 + $0x2a0] sm:$0xff] %v952_v39  ;;  %1051 = vst [vmem:[%s2601_s28 + $0x2a8] sm:$0xff] %v953_v2  ;;  %v855_v21 = vmul.f32 %v2570_v45, %v3347_v61  ;;  %v856_v7 = vmul.f32 %v2570_v45, %v3348_v15  ;;  %v857_v11 = vmul.f32 %v2570_v45, %v3349_v37 }
 0x26f   : > { %1052 = vst [vmem:[%s2601_s28 + $0x2b0] sm:$0xff] %v954_v49  ;;  %1053 = vst [vmem:[%s2601_s28 + $0x2b8] sm:$0xff] %v955_v19  ;;  %v858_v50 = vmul.f32 %v2570_v45, %v3350_v4  ;;  %v956_v3 = vadd.f32 %v2573_v54, %v851_v1  ;;  %v957_v31 = vadd.f32 %v2573_v54, %v852_v13 }
 0x270   : > { %v958_v33 = vadd.f32 %v2573_v54, %v853_v53  ;;  %v959_v8 = vadd.f32 %v2573_v54, %v854_v63  ;;  %v960_v56 = vadd.f32 %v2573_v54, %v855_v21  ;;  %v961_v10 = vadd.f32 %v2573_v54, %v856_v7 }
 0x271   : > { %v962_v12 = vadd.f32 %v2573_v54, %v857_v11  ;;  %v963_v52 = vadd.f32 %v2573_v54, %v858_v50  ;;  %1054 = vst [vmem:[%s2601_s28 + $0x2c0] sm:$0xff] %v956_v3  ;;  %1055 = vst [vmem:[%s2601_s28 + $0x2c8] sm:$0xff] %v957_v31  ;;  %v859_v60 = vmul.f32 %v2570_v45, %v3351_v58 }
 0x272   : > { %1056 = vst [vmem:[%s2601_s28 + $0x2d0] sm:$0xff] %v958_v33  ;;  %1057 = vst [vmem:[%s2601_s28 + $0x2d8] sm:$0xff] %v959_v8  ;;  %v860_v14 = vmul.f32 %v2570_v45, %v3352_v25 }
 0x273   : > { %1058 = vst [vmem:[%s2601_s28 + $0x2e0] sm:$0xff] %v960_v56  ;;  %1059 = vst [vmem:[%s2601_s28 + $0x2e8] sm:$0xff] %v961_v10  ;;  %v964_v16 = vadd.f32 %v2573_v54, %v859_v60 }
 0x274   : > { %1060 = vst [vmem:[%s2601_s28 + $0x2f0] sm:$0xff] %v962_v12  ;;  %1061 = vst [vmem:[%s2601_s28 + $0x2f8] sm:$0xff] %v963_v52  ;;  %v965_v18 = vadd.f32 %v2573_v54, %v860_v14 }
 0x275   : > { %1062 = vst [vmem:[%s2601_s28 + $0x300] sm:$0xff] %v964_v16 }
 0x276   : > { %1063 = vst [vmem:[%s2601_s28 + $0x308] sm:$0xff] %v965_v18 }
 0x277   : > { %1367 = shalt.err (!%p1364_p9)
}
 0x278   : > { %s1368_s17 = scalar_lea.hbm %s2968_s30, 12544  ;;  %s1372_s19 = scalar_lea.hbm %s3024_s3, 50176 }
 0x279   : > { %p1369_p7 = scmp.ne.s32.totalorder %s2968_s30, %s1368_s17  ;;  %p1373_p3 = scmp.lt.u32.totalorder %s2968_s30, %s3024_s3 }
 0x27a   : > { %p1374_p13 = scmp.lt.u32.totalorder %s1372_s19, %s1368_s17  ;;  %p1376_p0 = scmp.lt.u32.totalorder %s1368_s17, %s2968_s30 }
 0x27b   : > { %p1370_p11 = pnand %p1369_p7, %p3353_p4 }
 0x27c   : > { %p1375_p12 = por %p1374_p13, %p1373_p3 }
 0x27d   : > { %p1371_p1 = pneg %p1370_p11 }
 0x27e   : > { %p1377_p2 = por %p1376_p0, %p1375_p12 }
 0x280   : > { %p1378_p5 = pnand %p1377_p2, %p1371_p1 }
 0x282   : > { %1381 = shalt.err (!%p1378_p5)
}
 0x283   : > { %s1433_s8 = smov 128   ;;  %s1434_s9 = smov 512  }
 0x284   : > { %s1435_s22 = smov 8  }
 0x285   : > { %1206 = dma.vmem_to_hbm [thread:$0]  (%p3353_p4), %s2974_s6, 12544, %s2968_s30, %s1065_s4, %s1433_s8, %s1434_s9, %s1435_s22  }
 0x286 PF: > { %p1223_p6 = scmp.ge.s32.totalorder %s1424_s15, 2  ;;  %s1092_s28 = sand.u32 1, %s1412_s12  }
 0x287   : > { %p3354_p10 = scmp.ne.s32.totalorder %s3136_s24, 0  ;;  %s1093_s27 = scalar_lea.sflag [#allocation4], %s1092_s28 }
 0x289   : > { %p1219_p8 = pnand %p1223_p6, %p3354_p10 }
 0x28b   : > { %1407 = dma.done.wait (!%p1219_p8), %s1093_s27, 12544  }
 0x28c   : > { %1409 = vsyncadd (!%p1219_p8), %s1093_s27, 4294954752  ;;  %p19_p9 = scmp.ge.s32.totalorder %s1481_s18, 6   ;;  %s3355_s12 = smov %s1416_s13 }
 0x28d   : > { %s3356_s13 = smov %s1420_s14  ;;  %s3357_s14 = smov %s1493_s21 }
 0x28e   : > { %s3358_s15 = smov %s1481_s18  ;;  %21 = sbr.rel (!%p19_p9) target bundleno = 10 (0xa), region = 101 }
 0x295   :  { %1098 = vsyncpa [#allocation3], 1 }
 0x296   :  { %1100 = vsyncpa [#allocation3 + $0x1], 1 }
 0x297   :  { %1101 = vsyncpa [#allocation6], 1 }
 0x298   :  { %1103 = vsyncpa [#allocation6 + $0x1], 1 }
 0x299   :  { %1104 = vsyncpa [#allocation4], 1 }
 0x29a   :  { %1106 = vsyncpa [#allocation4 + $0x1], 1 }

</bundles_post_ra>
